<compile_context>
chip_gen: v7x
topology: tpu7x:2x2x1
jax: 0.10.0
libtpu: 0.0.40
codegen_flags: <defaults>
</compile_context>

<pallas_src>
import math

import jax
import jax.numpy as jnp
from jax.experimental import pallas as pl
from jax.experimental.pallas import tpu as pltpu

_EPS = 1e-5
_VMEM_LIMIT = 32 * 1024 * 1024   # explicit scoped-VMEM budget, safe on v5e/v6e/v7x


def _pick_block_l(L, halo):
    """Largest L tile that divides L, is sublane aligned and covers the causal halo."""
    for cand in (512, 256, 128, 64, 32, 16, 8):
        if cand <= L and L % cand == 0 and cand >= halo:
            return cand
    return L  # single tile over L (no halo carry needed)


def _cost(flops, transcendentals, nbytes):
    return pl.CostEstimate(flops=int(flops), transcendentals=int(transcendentals),
                           bytes_accessed=int(nbytes))


def _bn_scale_shift(stats, gamma, beta, count):
    """Finalize train-mode BatchNorm1d from accumulated per-channel sum/sumsq."""
    s = jnp.sum(stats[:, 0, :], axis=0)
    ss = jnp.sum(stats[:, 1, :], axis=0)
    mean = s / count
    var = jnp.maximum(ss / count - mean * mean, 0.0)     # biased variance (torch)
    scale = gamma.astype(jnp.float32) * jax.lax.rsqrt(var + _EPS)
    shift = beta.astype(jnp.float32) - mean * scale
    return scale.reshape(1, -1), shift.reshape(1, -1)


def gated_res_causal_conv_block(x_blc, params, *, kernel_size, dilation,
                                block_b=1, block_l=None):
    """GatedResCausalConvBlock forward. x_blc: [B, L, C_in] f32 -> [B, L, C_out]."""
    B, L, C_IN = x_blc.shape
    K, D1 = kernel_size, dilation
    D2 = 2 * D1
    P1 = D1 * (K - 1)          # causal halo of conv1
    P2 = D2 * (K - 1)          # causal halo of conv2
    C_OUT = params['w1g'].shape[0]

    # ----- tiling ----------------------------------------------------------
    if block_l is None:
        block_l = _pick_block_l(L, max(P1, P2, 8))
    if B % block_b != 0:
        raise ValueError("B must be divisible by block_b")
    if L % block_l != 0:
        raise ValueError("L must be divisible by block_l")
    nb, nl = B // block_b, L // block_l
    if nl > 1:
        if block_l % 8 != 0:
            raise ValueError("block_l must be sublane (8) aligned when tiling L")
        if block_l < max(P1, P2):
            raise ValueError("block_l must cover the causal halo")

    # ----- host-side parameter repacking (tiny, one-time under jit) --------
    def _tap_major(w):                       # torch (Cout, Cin, K) -> (K, Cin, Cout)
        return jnp.transpose(w, (2, 1, 0)).astype(jnp.float32)

    # gate ("convg") and signal ("convs") paths fused on the matmul output axis
    w1 = jnp.concatenate([_tap_major(params['w1g']), _tap_major(params['w1s'])], axis=2)
    b1 = jnp.concatenate([params['b1g'], params['b1s']]).reshape(1, 2 * C_OUT).astype(jnp.float32)
    w2 = jnp.concatenate([_tap_major(params['w2g']), _tap_major(params['w2s'])], axis=2)
    b2 = jnp.concatenate([params['b2g'], params['b2s']]).reshape(1, 2 * C_OUT).astype(jnp.float32)
    wsk = jnp.transpose(params['wskip'][:, :, 0], (1, 0)).astype(jnp.float32)   # (Cin, Cout)
    bsk = params['bskip'].reshape(1, C_OUT).astype(jnp.float32)

    # ----- in-kernel helpers (closures over static tile sizes) -------------
    def _fill_causal_window(win_ref, tile, pad):
        # Persistent VMEM window [pad halo | current tile]. The halo is carried
        # from the previous L tile (L axis is sequential/"arbitrary") instead of
        # re-reading HBM, and is zero at l == 0 == nn.Conv1d's causal zero pad.
        l = pl.program_id(1)
        if pad > 0:
            @pl.when(l == 0)
            def _zero_halo():
                win_ref[:, :pad, :] = jnp.zeros((block_b, pad, tile.shape[-1]),
                                                jnp.float32)

            @pl.when(l > 0)
            def _carry_halo():
                win_ref[:, :pad, :] = win_ref[:, block_l:block_l + pad, :]
        win_ref[:, pad:, :] = tile

    def _gated_conv(win_ref, w_ref, b_ref, dil):
        # K dilated taps; each tap is one lane-contraction MXU matmul with a
        # 2*C_OUT wide output (gate + signal fused). Ref-indexed tap loads:
        # no value-slice copies of the whole padded window.
        acc = jnp.zeros((block_b, block_l, 2 * C_OUT), jnp.float32)
        for k in range(K):                               # static unroll over taps
            tap = win_ref[:, k * dil:k * dil + block_l, :]
            acc = acc + jnp.einsum('blc,cn->bln', tap, w_ref[k],
                                   preferred_element_type=jnp.float32)
        z = acc + b_ref[...]
        return jax.nn.sigmoid(z[..., :C_OUT]) * jnp.tanh(z[..., C_OUT:])

    def _accum_stats(st_ref, gated):
        # Fused per-channel sum / sum-of-squares accumulated across L tiles:
        # the (1, 8, C) stats block stays VMEM-resident for one B tile's sweep.
        l = pl.program_id(1)

        @pl.when(l == 0)
        def _init():
            st_ref[...] = jnp.zeros_like(st_ref)

        flat = gated.reshape(block_b * block_l, C_OUT)
        s = jnp.sum(flat, axis=0, keepdims=True)
        ss = jnp.sum(flat * flat, axis=0, keepdims=True)
        row = jax.lax.broadcasted_iota(jnp.int32, (8, C_OUT), 0)
        upd = jnp.where(row == 0, s, jnp.where(row == 1, ss, 0.0))
        st_ref[...] = st_ref[...] + upd[None]

    # ----- kernels ----------------------------------------------------------
    def conv1_kernel(x_ref, w_ref, b_ref, g1_ref, st_ref, win_ref):
        _fill_causal_window(win_ref, x_ref[...], P1)
        gated = _gated_conv(win_ref, w_ref, b_ref, D1)
        g1_ref[...] = gated
        _accum_stats(st_ref, gated)

    def conv2_kernel(g1_ref, sc_ref, sh_ref, w_ref, b_ref, g2_ref, st_ref, win_ref):
        # BN1 applied as a fused scale/shift while filling the conv window
        # (single elementwise pass over the g1 tile).
        h1 = g1_ref[...] * sc_ref[...] + sh_ref[...]
        _fill_causal_window(win_ref, h1, P2)
        gated = _gated_conv(win_ref, w_ref, b_ref, D2)
        g2_ref[...] = gated
        _accum_stats(st_ref, gated)

    def residual_kernel(g2_ref, x_ref, sc_ref, sh_ref, wsk_ref, bsk_ref, o_ref):
        # BN2 scale/shift + 1x1 skip conv + residual add, fused in one pass.
        # Output stays channels-last so stacked blocks need no layout round trip.
        skip = jnp.einsum('blc,co->blo', x_ref[...], wsk_ref[...],
                          preferred_element_type=jnp.float32)
        o_ref[...] = g2_ref[...] * sc_ref[...] + sh_ref[...] + skip + bsk_ref[...]

    # ----- specs ------------------------------------------------------------
    act_in_spec = pl.BlockSpec((block_b, block_l, C_IN), lambda b, l: (b, l, 0))
    act_out_spec = pl.BlockSpec((block_b, block_l, C_OUT), lambda b, l: (b, l, 0))
    stats_spec = pl.BlockSpec((1, 8, C_OUT), lambda b, l: (b, 0, 0))

    def _full(shape):
        n = len(shape)
        return pl.BlockSpec(tuple(shape), lambda b, l, _n=n: (0,) * _n)

    seq_params = pltpu.CompilerParams(
        dimension_semantics=("parallel", "arbitrary"),
        vmem_limit_bytes=_VMEM_LIMIT)
    par_params = pltpu.CompilerParams(
        dimension_semantics=("parallel", "parallel"),
        vmem_limit_bytes=_VMEM_LIMIT)

    # ----- phase 1: gated conv1 + BN1 statistics ----------------------------
    g1, st1 = pl.pallas_call(
        conv1_kernel,
        out_shape=(jax.ShapeDtypeStruct((B, L, C_OUT), jnp.float32),
                   jax.ShapeDtypeStruct((nb, 8, C_OUT), jnp.float32)),
        grid_spec=pltpu.PrefetchScalarGridSpec(
            num_scalar_prefetch=0, grid=(nb, nl),
            in_specs=[act_in_spec, _full(w1.shape), _full(b1.shape)],
            out_specs=[act_out_spec, stats_spec],
            scratch_shapes=[pltpu.VMEM((block_b, P1 + block_l, C_IN), jnp.float32)]),
        compiler_params=seq_params,
        cost_estimate=_cost(2 * B * L * K * C_IN * 2 * C_OUT,
                            2 * B * L * C_OUT,
                            4 * (B * L * (C_IN + C_OUT) + w1.size + nb * 8 * C_OUT)),
    )(x_blc, w1, b1)

    scale1, shift1 = _bn_scale_shift(st1, params['bn1_gamma'], params['bn1_beta'], B * L)

    # ----- phase 2: BN1-normalize + gated conv2 + BN2 statistics ------------
    g2, st2 = pl.pallas_call(
        conv2_kernel,
        out_shape=(jax.ShapeDtypeStruct((B, L, C_OUT), jnp.float32),
                   jax.ShapeDtypeStruct((nb, 8, C_OUT), jnp.float32)),
        grid_spec=pltpu.PrefetchScalarGridSpec(
            num_scalar_prefetch=0, grid=(nb, nl),
            in_specs=[act_out_spec, _full(scale1.shape), _full(shift1.shape),
                      _full(w2.shape), _full(b2.shape)],
            out_specs=[act_out_spec, stats_spec],
            scratch_shapes=[pltpu.VMEM((block_b, P2 + block_l, C_OUT), jnp.float32)]),
        compiler_params=seq_params,
        cost_estimate=_cost(2 * B * L * K * C_OUT * 2 * C_OUT,
                            2 * B * L * C_OUT,
                            4 * (2 * B * L * C_OUT + w2.size + nb * 8 * C_OUT)),
    )(g1, scale1, shift1, w2, b2)

    scale2, shift2 = _bn_scale_shift(st2, params['bn2_gamma'], params['bn2_beta'], B * L)

    # ----- phase 3: BN2-normalize + skip conv + residual ---------------------
    out = pl.pallas_call(
        residual_kernel,
        out_shape=jax.ShapeDtypeStruct((B, L, C_OUT), jnp.float32),
        grid_spec=pltpu.PrefetchScalarGridSpec(
            num_scalar_prefetch=0, grid=(nb, nl),
            in_specs=[act_out_spec, act_in_spec, _full(scale2.shape), _full(shift2.shape),
                      _full(wsk.shape), _full(bsk.shape)],
            out_specs=act_out_spec),
        compiler_params=par_params,
        cost_estimate=_cost(2 * B * L * C_IN * C_OUT + 4 * B * L * C_OUT, 0,
                            4 * (B * L * (C_IN + 2 * C_OUT))),
    )(g2, x_blc, scale2, shift2, wsk, bsk)

    return out


# -------------------- pure-JAX reference (torch-faithful, NCL) --------------
def _reference_ncl(x_ncl, params, *, kernel_size, dilation):
    K = kernel_size

    def causal_conv(v, w, b, dil, k):
        pad = dil * (k - 1)
        y = jax.lax.conv_general_dilated(
            v, w, window_strides=(1,), padding=[(pad, pad)],
            rhs_dilation=(dil,), dimension_numbers=('NCH', 'OIH', 'NCH'))
        y = y + b[None, :, None]
        return y if pad == 0 else y[:, :, :-pad]

    def gated(v, wg, bg, ws, bs, dil):
        return jax.nn.sigmoid(causal_conv(v, wg, bg, dil, K)) * \
               jnp.tanh(causal_conv(v, ws, bs, dil, K))

    def bn(v, gamma, beta):
        mean = jnp.mean(v, axis=(0, 2), keepdims=True)
        var = jnp.mean((v - mean) ** 2, axis=(0, 2), keepdims=True)
        return ((v - mean) * jax.lax.rsqrt(var + _EPS) * gamma[None, :, None]
                + beta[None, :, None])

    x_skip = causal_conv(x_ncl, params['wskip'], params['bskip'], 1, 1)
    h = bn(gated(x_ncl, params['w1g'], params['b1g'], params['w1s'], params['b1s'],
                 dilation),
           params['bn1_gamma'], params['bn1_beta'])
    h = bn(gated(h, params['w2g'], params['b2g'], params['w2s'], params['b2s'],
                 2 * dilation),
           params['bn2_gamma'], params['bn2_beta'])
    return h + x_skip


if __name__ == "__main__":
    # Shapes consistent with WavenetEncoder's CNN input [B*E, 3*n_in, T]:
    # n_in = 4 point features -> C_IN = 12, n_hid = 128 -> C_OUT (lane dense),
    # a small edge batch B = 4, T = 128 timesteps, first-block dilation = 1.
    B, C_IN, C_OUT, L = 4, 12, 128, 128
    K, D = 5, 1

    key = jax.random.PRNGKey(0)
    kx, k1g, k1s, k2g, k2s, ksk = jax.random.split(key, 6)

    # torch init: conv weight ~ N(0, sqrt(2 / (K * out_channels))), bias = 0.1,
    # BN gamma = 1, beta = 0 (fresh module, training-mode batch statistics).
    std = math.sqrt(2.0 / (K * C_OUT))
    std_sk = math.sqrt(2.0 / (1 * C_OUT))
    params = {
        'w1g': std * jax.random.normal(k1g, (C_OUT, C_IN, K), jnp.float32),
        'w1s': std * jax.random.normal(k1s, (C_OUT, C_IN, K), jnp.float32),
        'b1g': jnp.full((C_OUT,), 0.1, jnp.float32),
        'b1s': jnp.full((C_OUT,), 0.1, jnp.float32),
        'w2g': std * jax.random.normal(k2g, (C_OUT, C_OUT, K), jnp.float32),
        'w2s': std * jax.random.normal(k2s, (C_OUT, C_OUT, K), jnp.float32),
        'b2g': jnp.full((C_OUT,), 0.1, jnp.float32),
        'b2s': jnp.full((C_OUT,), 0.1, jnp.float32),
        'wskip': std_sk * jax.random.normal(ksk, (C_OUT, C_IN, 1), jnp.float32),
        'bskip': jnp.full((C_OUT,), 0.1, jnp.float32),
        'bn1_gamma': jnp.ones((C_OUT,), jnp.float32),
        'bn1_beta': jnp.zeros((C_OUT,), jnp.float32),
        'bn2_gamma': jnp.ones((C_OUT,), jnp.float32),
        'bn2_beta': jnp.zeros((C_OUT,), jnp.float32),
    }

    x_ncl = jax.random.normal(kx, (B, C_IN, L), jnp.float32)   # module layout [B, C, L]
    x_blc = jnp.transpose(x_ncl, (0, 2, 1))                    # kernel layout [B, L, C]

    # block_l=32 exercises the multi-tile halo carry + cross-tile BN reduction
    # at this small L; at production L the auto-picker chooses 256/512 tiles.
    fwd = jax.jit(lambda xb: gated_res_causal_conv_block(
        xb, params, kernel_size=K, dilation=D, block_b=1, block_l=32))
    out_blc = jax.block_until_ready(fwd(x_blc))

    ref_blc = jnp.transpose(
        _reference_ncl(x_ncl, params, kernel_size=K, dilation=D), (0, 2, 1))

    assert out_blc.shape == (B, L, C_OUT), out_blc.shape
    max_err = float(jnp.max(jnp.abs(out_blc - ref_blc)))
    assert jnp.allclose(out_blc, ref_blc, atol=2e-3, rtol=2e-3), max_err

    print("KERNEL_OK")
</pallas_src>

<mosaic_0001>
module attributes {stable_mosaic.version = 11 : i64} {
  func.func @conv1_kernel(%arg0: i32, %arg1: i32, %arg2: memref<1x32x12xf32, #tpu.memory_space<vmem>>, %arg3: memref<5x12x256xf32, #tpu.memory_space<vmem>>, %arg4: memref<1x256xf32, #tpu.memory_space<vmem>>, %arg5: memref<1x32x128xf32, #tpu.memory_space<vmem>>, %arg6: memref<1x8x128xf32, #tpu.memory_space<vmem>>, %arg7: memref<1x36x12xf32, #tpu.memory_space<vmem>>) attributes {dimension_semantics = [#tpu.dimension_semantics<parallel>, #tpu.dimension_semantics<arbitrary>], iteration_bounds = array<i64: 4, 4>, scalar_prefetch = 0 : i64, scratch_operands = 1 : i64, tpu.core_type = #tpu.core_type<tc>, window_params = [{transform_indices = @transform_0, window_bounds = array<i64: 1, 32, 12>}, {pipeline_mode = #tpu.pipeline_mode<synchronous>, transform_indices = @transform_1, window_bounds = array<i64: 5, 12, 256>}, {pipeline_mode = #tpu.pipeline_mode<synchronous>, transform_indices = @transform_2, window_bounds = array<i64: 1, 256>}, {transform_indices = @transform_3, window_bounds = array<i64: 1, 32, 128>}, {transform_indices = @transform_4, window_bounds = array<i64: 1, 8, 128>}]} {
    %c0 = arith.constant 0 : index
    %c0_0 = arith.constant 0 : index
    %c0_1 = arith.constant 0 : index
    %0 = vector.load %arg2[%c0, %c0_0, %c0_1] : memref<1x32x12xf32, #tpu.memory_space<vmem>>, vector<1x32x12xf32>
    %c0_i32 = arith.constant 0 : i32
    %1 = arith.cmpi eq, %arg1, %c0_i32 : i32
    %2 = arith.extui %1 : i1 to i32
    %c0_i32_2 = arith.constant 0 : i32
    %3 = arith.cmpi ne, %2, %c0_i32_2 : i32
    scf.if %3 {
      %cst_57 = arith.constant 0.000000e+00 : f32
      %73 = vector.broadcast %cst_57 : f32 to vector<1x4x12xf32>
      %c0_58 = arith.constant 0 : index
      %c0_59 = arith.constant 0 : index
      %c0_60 = arith.constant 0 : index
      %74 = vector.load %arg7[%c0_58, %c0_59, %c0_60] : memref<1x36x12xf32, #tpu.memory_space<vmem>>, vector<1x4x12xf32>
      tpu.vector_store %arg7[%c0_58, %c0_59, %c0_60], %73 {strides = array<i32>} : memref<1x36x12xf32, #tpu.memory_space<vmem>>, vector<1x4x12xf32>,
    } else {
    }
    %c0_i32_3 = arith.constant 0 : i32
    %4 = arith.cmpi sgt, %arg1, %c0_i32_3 : i32
    %5 = arith.extui %4 : i1 to i32
    %c0_i32_4 = arith.constant 0 : i32
    %6 = arith.cmpi ne, %5, %c0_i32_4 : i32
    scf.if %6 {
      %c0_57 = arith.constant 0 : index
      %c32 = arith.constant 32 : index
      %c0_58 = arith.constant 0 : index
      %73 = vector.load %arg7[%c0_57, %c32, %c0_58] : memref<1x36x12xf32, #tpu.memory_space<vmem>>, vector<1x4x12xf32>
      %c0_59 = arith.constant 0 : index
      %c0_60 = arith.constant 0 : index
      %c0_61 = arith.constant 0 : index
      %74 = vector.load %arg7[%c0_59, %c0_60, %c0_61] : memref<1x36x12xf32, #tpu.memory_space<vmem>>, vector<1x4x12xf32>
      tpu.vector_store %arg7[%c0_59, %c0_60, %c0_61], %73 {strides = array<i32>} : memref<1x36x12xf32, #tpu.memory_space<vmem>>, vector<1x4x12xf32>,
    } else {
    }
    %c0_5 = arith.constant 0 : index
    %c4 = arith.constant 4 : index
    %c0_6 = arith.constant 0 : index
    %7 = vector.load %arg7[%c0_5, %c4, %c0_6] : memref<1x36x12xf32, #tpu.memory_space<vmem>>, vector<1x32x12xf32>
    tpu.vector_store %arg7[%c0_5, %c4, %c0_6], %0 {strides = array<i32>} : memref<1x36x12xf32, #tpu.memory_space<vmem>>, vector<1x32x12xf32>,
    %cst = arith.constant 0.000000e+00 : f32
    %8 = vector.broadcast %cst : f32 to vector<1x32x256xf32>
    %c0_7 = arith.constant 0 : index
    %c0_8 = arith.constant 0 : index
    %c0_9 = arith.constant 0 : index
    %9 = vector.load %arg7[%c0_7, %c0_8, %c0_9] : memref<1x36x12xf32, #tpu.memory_space<vmem>>, vector<1x32x12xf32>
    %c0_10 = arith.constant 0 : index
    %c0_11 = arith.constant 0 : index
    %c0_12 = arith.constant 0 : index
    %10 = vector.load %arg3[%c0_10, %c0_11, %c0_12] : memref<5x12x256xf32, #tpu.memory_space<vmem>>, vector<1x12x256xf32>
    %11 = vector.shape_cast %10 : vector<1x12x256xf32> to vector<12x256xf32>
    "tpu.trace_start"() <{level = 10 : i32, message = "blc,cn->bln"}> : () -> ()
    %cst_13 = arith.constant dense<0.000000e+00> : vector<1x32x256xf32>
    %12 = tpu.matmul %9, %11, %cst_13 {dimension_numbers = #tpu.dot_dimension_numbers<[2], [0], [0, 1], [1], [0, 0, 0, 1, 1, 1], [], []>} : vector<1x32x12xf32>, vector<12x256xf32>, vector<1x32x256xf32> -> vector<1x32x256xf32>
    "tpu.trace_stop"() : () -> ()
    %13 = arith.addf %8, %12 : vector<1x32x256xf32>
    %c0_14 = arith.constant 0 : index
    %c1 = arith.constant 1 : index
    %c0_15 = arith.constant 0 : index
    %14 = vector.load %arg7[%c0_14, %c1, %c0_15] : memref<1x36x12xf32, #tpu.memory_space<vmem>>, vector<1x32x12xf32>
    %c1_16 = arith.constant 1 : index
    %c0_17 = arith.constant 0 : index
    %c0_18 = arith.constant 0 : index
    %15 = vector.load %arg3[%c1_16, %c0_17, %c0_18] : memref<5x12x256xf32, #tpu.memory_space<vmem>>, vector<1x12x256xf32>
    %16 = vector.shape_cast %15 : vector<1x12x256xf32> to vector<12x256xf32>
    "tpu.trace_start"() <{level = 10 : i32, message = "blc,cn->bln"}> : () -> ()
    %cst_19 = arith.constant dense<0.000000e+00> : vector<1x32x256xf32>
    %17 = tpu.matmul %14, %16, %cst_19 {dimension_numbers = #tpu.dot_dimension_numbers<[2], [0], [0, 1], [1], [0, 0, 0, 1, 1, 1], [], []>} : vector<1x32x12xf32>, vector<12x256xf32>, vector<1x32x256xf32> -> vector<1x32x256xf32>
    "tpu.trace_stop"() : () -> ()
    %18 = arith.addf %13, %17 : vector<1x32x256xf32>
    %c0_20 = arith.constant 0 : index
    %c2 = arith.constant 2 : index
    %c0_21 = arith.constant 0 : index
    %19 = vector.load %arg7[%c0_20, %c2, %c0_21] : memref<1x36x12xf32, #tpu.memory_space<vmem>>, vector<1x32x12xf32>
    %c2_22 = arith.constant 2 : index
    %c0_23 = arith.constant 0 : index
    %c0_24 = arith.constant 0 : index
    %20 = vector.load %arg3[%c2_22, %c0_23, %c0_24] : memref<5x12x256xf32, #tpu.memory_space<vmem>>, vector<1x12x256xf32>
    %21 = vector.shape_cast %20 : vector<1x12x256xf32> to vector<12x256xf32>
    "tpu.trace_start"() <{level = 10 : i32, message = "blc,cn->bln"}> : () -> ()
    %cst_25 = arith.constant dense<0.000000e+00> : vector<1x32x256xf32>
    %22 = tpu.matmul %19, %21, %cst_25 {dimension_numbers = #tpu.dot_dimension_numbers<[2], [0], [0, 1], [1], [0, 0, 0, 1, 1, 1], [], []>} : vector<1x32x12xf32>, vector<12x256xf32>, vector<1x32x256xf32> -> vector<1x32x256xf32>
    "tpu.trace_stop"() : () -> ()
    %23 = arith.addf %18, %22 : vector<1x32x256xf32>
    %c0_26 = arith.constant 0 : index
    %c3 = arith.constant 3 : index
    %c0_27 = arith.constant 0 : index
    %24 = vector.load %arg7[%c0_26, %c3, %c0_27] : memref<1x36x12xf32, #tpu.memory_space<vmem>>, vector<1x32x12xf32>
    %c3_28 = arith.constant 3 : index
    %c0_29 = arith.constant 0 : index
    %c0_30 = arith.constant 0 : index
    %25 = vector.load %arg3[%c3_28, %c0_29, %c0_30] : memref<5x12x256xf32, #tpu.memory_space<vmem>>, vector<1x12x256xf32>
    %26 = vector.shape_cast %25 : vector<1x12x256xf32> to vector<12x256xf32>
    "tpu.trace_start"() <{level = 10 : i32, message = "blc,cn->bln"}> : () -> ()
    %cst_31 = arith.constant dense<0.000000e+00> : vector<1x32x256xf32>
    %27 = tpu.matmul %24, %26, %cst_31 {dimension_numbers = #tpu.dot_dimension_numbers<[2], [0], [0, 1], [1], [0, 0, 0, 1, 1, 1], [], []>} : vector<1x32x12xf32>, vector<12x256xf32>, vector<1x32x256xf32> -> vector<1x32x256xf32>
    "tpu.trace_stop"() : () -> ()
    %28 = arith.addf %23, %27 : vector<1x32x256xf32>
    %c0_32 = arith.constant 0 : index
    %c4_33 = arith.constant 4 : index
    %c0_34 = arith.constant 0 : index
    %29 = vector.load %arg7[%c0_32, %c4_33, %c0_34] : memref<1x36x12xf32, #tpu.memory_space<vmem>>, vector<1x32x12xf32>
    %c4_35 = arith.constant 4 : index
    %c0_36 = arith.constant 0 : index
    %c0_37 = arith.constant 0 : index
    %30 = vector.load %arg3[%c4_35, %c0_36, %c0_37] : memref<5x12x256xf32, #tpu.memory_space<vmem>>, vector<1x12x256xf32>
    %31 = vector.shape_cast %30 : vector<1x12x256xf32> to vector<12x256xf32>
    "tpu.trace_start"() <{level = 10 : i32, message = "blc,cn->bln"}> : () -> ()
    %cst_38 = arith.constant dense<0.000000e+00> : vector<1x32x256xf32>
    %32 = tpu.matmul %29, %31, %cst_38 {dimension_numbers = #tpu.dot_dimension_numbers<[2], [0], [0, 1], [1], [0, 0, 0, 1, 1, 1], [], []>} : vector<1x32x12xf32>, vector<12x256xf32>, vector<1x32x256xf32> -> vector<1x32x256xf32>
    "tpu.trace_stop"() : () -> ()
    %33 = arith.addf %28, %32 : vector<1x32x256xf32>
    %c0_39 = arith.constant 0 : index
    %c0_40 = arith.constant 0 : index
    %34 = vector.load %arg4[%c0_39, %c0_40] : memref<1x256xf32, #tpu.memory_space<vmem>>, vector<1x256xf32>
    %35 = vector.shape_cast %34 : vector<1x256xf32> to vector<1x1x256xf32>
    %36 = vector.broadcast %35 : vector<1x1x256xf32> to vector<1x32x256xf32>
    %37 = arith.addf %33, %36 : vector<1x32x256xf32>
    %38 = vector.extract_strided_slice %37 {offsets = [0, 0, 0], sizes = [1, 32, 128], strides = [1, 1, 1]} : vector<1x32x256xf32> to vector<1x32x128xf32>
    %39 = arith.negf %38 : vector<1x32x128xf32>
    %40 = math.exp %39 : vector<1x32x128xf32>
    %cst_41 = arith.constant 1.000000e+00 : f32
    %41 = vector.broadcast %cst_41 : f32 to vector<1x32x128xf32>
    %42 = arith.addf %41, %40 : vector<1x32x128xf32>
    %43 = arith.divf %41, %42 : vector<1x32x128xf32>
    %44 = vector.extract_strided_slice %37 {offsets = [0, 0, 128], sizes = [1, 32, 128], strides = [1, 1, 1]} : vector<1x32x256xf32> to vector<1x32x128xf32>
    %45 = math.tanh %44 : vector<1x32x128xf32>
    %46 = arith.mulf %43, %45 : vector<1x32x128xf32>
    %c0_42 = arith.constant 0 : index
    %c0_43 = arith.constant 0 : index
    %c0_44 = arith.constant 0 : index
    %47 = vector.load %arg5[%c0_42, %c0_43, %c0_44] : memref<1x32x128xf32, #tpu.memory_space<vmem>>, vector<1x32x128xf32>
    tpu.vector_store %arg5[%c0_42, %c0_43, %c0_44], %46 {strides = array<i32>} : memref<1x32x128xf32, #tpu.memory_space<vmem>>, vector<1x32x128xf32>,
    %c0_i32_45 = arith.constant 0 : i32
    %48 = arith.cmpi eq, %arg1, %c0_i32_45 : i32
    %49 = arith.extui %48 : i1 to i32
    %c0_i32_46 = arith.constant 0 : i32
    %50 = arith.cmpi ne, %49, %c0_i32_46 : i32
    scf.if %50 {
      %cst_57 = arith.constant 0.000000e+00 : f32
      %73 = vector.broadcast %cst_57 : f32 to vector<1x8x128xf32>
      %c0_58 = arith.constant 0 : index
      %c0_59 = arith.constant 0 : index
      %c0_60 = arith.constant 0 : index
      %74 = vector.load %arg6[%c0_58, %c0_59, %c0_60] : memref<1x8x128xf32, #tpu.memory_space<vmem>>, vector<1x8x128xf32>
      tpu.vector_store %arg6[%c0_58, %c0_59, %c0_60], %73 {strides = array<i32>} : memref<1x8x128xf32, #tpu.memory_space<vmem>>, vector<1x8x128xf32>,
    } else {
    }
    %51 = vector.shape_cast %46 : vector<1x32x128xf32> to vector<32x128xf32>
    %cst_47 = arith.constant dense<0.000000e+00> : vector<128xf32>
    %52 = vector.multi_reduction <add>, %51, %cst_47 [0] : vector<32x128xf32> to vector<128xf32>
    %53 = vector.shape_cast %52 : vector<128xf32> to vector<1x128xf32>
    %54 = arith.mulf %51, %51 : vector<32x128xf32>
    %cst_48 = arith.constant dense<0.000000e+00> : vector<128xf32>
    %55 = vector.multi_reduction <add>, %54, %cst_48 [0] : vector<32x128xf32> to vector<128xf32>
    %56 = vector.shape_cast %55 : vector<128xf32> to vector<1x128xf32>
    %57 = tpu.iota {dimensions = array<i32: 0>} : vector<8x128xi32>
    %c0_i32_49 = arith.constant 0 : i32
    %58 = vector.broadcast %c0_i32_49 : i32 to vector<8x128xi32>
    %59 = arith.cmpi eq, %57, %58 : vector<8x128xi32>
    %c1_i32 = arith.constant 1 : i32
    %60 = vector.broadcast %c1_i32 : i32 to vector<8x128xi32>
    %61 = arith.cmpi eq, %57, %60 : vector<8x128xi32>
    %cst_50 = arith.constant 0.000000e+00 : f32
    %62 = vector.shape_cast %56 : vector<1x128xf32> to vector<1x128xf32>
    %63 = vector.broadcast %62 : vector<1x128xf32> to vector<8x128xf32>
    %64 = vector.broadcast %cst_50 : f32 to vector<8x128xf32>
    %65 = arith.select %61, %63, %64 : vector<8x128xi1>, vector<8x128xf32>
    %66 = vector.shape_cast %53 : vector<1x128xf32> to vector<1x128xf32>
    %67 = vector.broadcast %66 : vector<1x128xf32> to vector<8x128xf32>
    %68 = arith.select %59, %67, %65 : vector<8x128xi1>, vector<8x128xf32>
    %c0_51 = arith.constant 0 : index
    %c0_52 = arith.constant 0 : index
    %c0_53 = arith.constant 0 : index
    %69 = vector.load %arg6[%c0_51, %c0_52, %c0_53] : memref<1x8x128xf32, #tpu.memory_space<vmem>>, vector<1x8x128xf32>
    %70 = vector.shape_cast %68 : vector<8x128xf32> to vector<1x8x128xf32>
    %71 = arith.addf %69, %70 : vector<1x8x128xf32>
    %c0_54 = arith.constant 0 : index
    %c0_55 = arith.constant 0 : index
    %c0_56 = arith.constant 0 : index
    %72 = vector.load %arg6[%c0_54, %c0_55, %c0_56] : memref<1x8x128xf32, #tpu.memory_space<vmem>>, vector<1x8x128xf32>
    tpu.vector_store %arg6[%c0_54, %c0_55, %c0_56], %71 {strides = array<i32>} : memref<1x8x128xf32, #tpu.memory_space<vmem>>, vector<1x8x128xf32>,
    return
  }
  func.func @transform_0(%arg0: i32, %arg1: i32) -> (i32, i32, i32) {
    %c0_i32 = arith.constant 0 : i32
    %c0_i32_0 = arith.constant 0 : i32
    return %arg0, %arg1, %c0_i32 : i32, i32, i32
  }
  func.func @transform_1(%arg0: i32, %arg1: i32) -> (i32, i32, i32) {
    %c0_i32 = arith.constant 0 : i32
    %c0_i32_0 = arith.constant 0 : i32
    %c0_i32_1 = arith.constant 0 : i32
    %c0_i32_2 = arith.constant 0 : i32
    return %c0_i32, %c0_i32_0, %c0_i32_1 : i32, i32, i32
  }
  func.func @transform_2(%arg0: i32, %arg1: i32) -> (i32, i32) {
    %c0_i32 = arith.constant 0 : i32
    %c0_i32_0 = arith.constant 0 : i32
    %c0_i32_1 = arith.constant 0 : i32
    return %c0_i32, %c0_i32_0 : i32, i32
  }
  func.func @transform_3(%arg0: i32, %arg1: i32) -> (i32, i32, i32) {
    %c0_i32 = arith.constant 0 : i32
    %c0_i32_0 = arith.constant 0 : i32
    return %arg0, %arg1, %c0_i32 : i32, i32, i32
  }
  func.func @transform_4(%arg0: i32, %arg1: i32) -> (i32, i32, i32) {
    %c0_i32 = arith.constant 0 : i32
    %c0_i32_0 = arith.constant 0 : i32
    %c0_i32_1 = arith.constant 0 : i32
    return %arg0, %c0_i32, %c0_i32_0 : i32, i32, i32
  }
}

module attributes {stable_mosaic.version = 11 : i64} {
  func.func @residual_kernel(%arg0: i32, %arg1: i32, %arg2: memref<1x32x128xf32, #tpu.memory_space<vmem>>, %arg3: memref<1x32x12xf32, #tpu.memory_space<vmem>>, %arg4: memref<1x128xf32, #tpu.memory_space<vmem>>, %arg5: memref<1x128xf32, #tpu.memory_space<vmem>>, %arg6: memref<12x128xf32, #tpu.memory_space<vmem>>, %arg7: memref<1x128xf32, #tpu.memory_space<vmem>>, %arg8: memref<1x32x128xf32, #tpu.memory_space<vmem>>) attributes {dimension_semantics = [#tpu.dimension_semantics<parallel>, #tpu.dimension_semantics<parallel>], iteration_bounds = array<i64: 4, 4>, scalar_prefetch = 0 : i64, scratch_operands = 0 : i64, tpu.core_type = #tpu.core_type<tc>, window_params = [{transform_indices = @transform_0, window_bounds = array<i64: 1, 32, 128>}, {transform_indices = @transform_1, window_bounds = array<i64: 1, 32, 12>}, {pipeline_mode = #tpu.pipeline_mode<synchronous>, transform_indices = @transform_2, window_bounds = array<i64: 1, 128>}, {pipeline_mode = #tpu.pipeline_mode<synchronous>, transform_indices = @transform_3, window_bounds = array<i64: 1, 128>}, {pipeline_mode = #tpu.pipeline_mode<synchronous>, transform_indices = @transform_4, window_bounds = array<i64: 12, 128>}, {pipeline_mode = #tpu.pipeline_mode<synchronous>, transform_indices = @transform_5, window_bounds = array<i64: 1, 128>}, {transform_indices = @transform_6, window_bounds = array<i64: 1, 32, 128>}]} {
    %c0 = arith.constant 0 : index
    %c0_0 = arith.constant 0 : index
    %c0_1 = arith.constant 0 : index
    %0 = vector.load %arg3[%c0, %c0_0, %c0_1] : memref<1x32x12xf32, #tpu.memory_space<vmem>>, vector<1x32x12xf32>
    %c0_2 = arith.constant 0 : index
    %c0_3 = arith.constant 0 : index
    %1 = vector.load %arg6[%c0_2, %c0_3] : memref<12x128xf32, #tpu.memory_space<vmem>>, vector<12x128xf32>
    "tpu.trace_start"() <{level = 10 : i32, message = "blc,co->blo"}> : () -> ()
    %cst = arith.constant dense<0.000000e+00> : vector<1x32x128xf32>
    %2 = tpu.matmul %0, %1, %cst {dimension_numbers = #tpu.dot_dimension_numbers<[2], [0], [0, 1], [1], [0, 0, 0, 1, 1, 1], [], []>} : vector<1x32x12xf32>, vector<12x128xf32>, vector<1x32x128xf32> -> vector<1x32x128xf32>
    "tpu.trace_stop"() : () -> ()
    %c0_4 = arith.constant 0 : index
    %c0_5 = arith.constant 0 : index
    %c0_6 = arith.constant 0 : index
    %3 = vector.load %arg2[%c0_4, %c0_5, %c0_6] : memref<1x32x128xf32, #tpu.memory_space<vmem>>, vector<1x32x128xf32>
    %c0_7 = arith.constant 0 : index
    %c0_8 = arith.constant 0 : index
    %4 = vector.load %arg4[%c0_7, %c0_8] : memref<1x128xf32, #tpu.memory_space<vmem>>, vector<1x128xf32>
    %5 = vector.shape_cast %4 : vector<1x128xf32> to vector<1x1x128xf32>
    %6 = vector.broadcast %5 : vector<1x1x128xf32> to vector<1x32x128xf32>
    %7 = arith.mulf %3, %6 : vector<1x32x128xf32>
    %c0_9 = arith.constant 0 : index
    %c0_10 = arith.constant 0 : index
    %8 = vector.load %arg5[%c0_9, %c0_10] : memref<1x128xf32, #tpu.memory_space<vmem>>, vector<1x128xf32>
    %9 = vector.shape_cast %8 : vector<1x128xf32> to vector<1x1x128xf32>
    %10 = vector.broadcast %9 : vector<1x1x128xf32> to vector<1x32x128xf32>
    %11 = arith.addf %7, %10 : vector<1x32x128xf32>
    %12 = arith.addf %11, %2 : vector<1x32x128xf32>
    %c0_11 = arith.constant 0 : index
    %c0_12 = arith.constant 0 : index
    %13 = vector.load %arg7[%c0_11, %c0_12] : memref<1x128xf32, #tpu.memory_space<vmem>>, vector<1x128xf32>
    %14 = vector.shape_cast %13 : vector<1x128xf32> to vector<1x1x128xf32>
    %15 = vector.broadcast %14 : vector<1x1x128xf32> to vector<1x32x128xf32>
    %16 = arith.addf %12, %15 : vector<1x32x128xf32>
    %c0_13 = arith.constant 0 : index
    %c0_14 = arith.constant 0 : index
    %c0_15 = arith.constant 0 : index
    %17 = vector.load %arg8[%c0_13, %c0_14, %c0_15] : memref<1x32x128xf32, #tpu.memory_space<vmem>>, vector<1x32x128xf32>
    tpu.vector_store %arg8[%c0_13, %c0_14, %c0_15], %16 {strides = array<i32>} : memref<1x32x128xf32, #tpu.memory_space<vmem>>, vector<1x32x128xf32>,
    return
  }
  func.func @transform_0(%arg0: i32, %arg1: i32) -> (i32, i32, i32) {
    %c0_i32 = arith.constant 0 : i32
    %c0_i32_0 = arith.constant 0 : i32
    return %arg0, %arg1, %c0_i32 : i32, i32, i32
  }
  func.func @transform_1(%arg0: i32, %arg1: i32) -> (i32, i32, i32) {
    %c0_i32 = arith.constant 0 : i32
    %c0_i32_0 = arith.constant 0 : i32
    return %arg0, %arg1, %c0_i32 : i32, i32, i32
  }
  func.func @transform_2(%arg0: i32, %arg1: i32) -> (i32, i32) {
    %c0_i32 = arith.constant 0 : i32
    %c0_i32_0 = arith.constant 0 : i32
    %c0_i32_1 = arith.constant 0 : i32
    return %c0_i32, %c0_i32_0 : i32, i32
  }
  func.func @transform_3(%arg0: i32, %arg1: i32) -> (i32, i32) {
    %c0_i32 = arith.constant 0 : i32
    %c0_i32_0 = arith.constant 0 : i32
    %c0_i32_1 = arith.constant 0 : i32
    return %c0_i32, %c0_i32_0 : i32, i32
  }
  func.func @transform_4(%arg0: i32, %arg1: i32) -> (i32, i32) {
    %c0_i32 = arith.constant 0 : i32
    %c0_i32_0 = arith.constant 0 : i32
    %c0_i32_1 = arith.constant 0 : i32
    return %c0_i32, %c0_i32_0 : i32, i32
  }
  func.func @transform_5(%arg0: i32, %arg1: i32) -> (i32, i32) {
    %c0_i32 = arith.constant 0 : i32
    %c0_i32_0 = arith.constant 0 : i32
    %c0_i32_1 = arith.constant 0 : i32
    return %c0_i32, %c0_i32_0 : i32, i32
  }
  func.func @transform_6(%arg0: i32, %arg1: i32) -> (i32, i32, i32) {
    %c0_i32 = arith.constant 0 : i32
    %c0_i32_0 = arith.constant 0 : i32
    return %arg0, %arg1, %c0_i32 : i32, i32, i32
  }
}

module attributes {stable_mosaic.version = 11 : i64} {
  func.func @conv2_kernel(%arg0: i32, %arg1: i32, %arg2: memref<1x32x128xf32, #tpu.memory_space<vmem>>, %arg3: memref<1x128xf32, #tpu.memory_space<vmem>>, %arg4: memref<1x128xf32, #tpu.memory_space<vmem>>, %arg5: memref<5x128x256xf32, #tpu.memory_space<vmem>>, %arg6: memref<1x256xf32, #tpu.memory_space<vmem>>, %arg7: memref<1x32x128xf32, #tpu.memory_space<vmem>>, %arg8: memref<1x8x128xf32, #tpu.memory_space<vmem>>, %arg9: memref<1x40x128xf32, #tpu.memory_space<vmem>>) attributes {dimension_semantics = [#tpu.dimension_semantics<parallel>, #tpu.dimension_semantics<arbitrary>], iteration_bounds = array<i64: 4, 4>, scalar_prefetch = 0 : i64, scratch_operands = 1 : i64, tpu.core_type = #tpu.core_type<tc>, window_params = [{transform_indices = @transform_0, window_bounds = array<i64: 1, 32, 128>}, {pipeline_mode = #tpu.pipeline_mode<synchronous>, transform_indices = @transform_1, window_bounds = array<i64: 1, 128>}, {pipeline_mode = #tpu.pipeline_mode<synchronous>, transform_indices = @transform_2, window_bounds = array<i64: 1, 128>}, {pipeline_mode = #tpu.pipeline_mode<synchronous>, transform_indices = @transform_3, window_bounds = array<i64: 5, 128, 256>}, {pipeline_mode = #tpu.pipeline_mode<synchronous>, transform_indices = @transform_4, window_bounds = array<i64: 1, 256>}, {transform_indices = @transform_5, window_bounds = array<i64: 1, 32, 128>}, {transform_indices = @transform_6, window_bounds = array<i64: 1, 8, 128>}]} {
    %c0 = arith.constant 0 : index
    %c0_0 = arith.constant 0 : index
    %c0_1 = arith.constant 0 : index
    %0 = vector.load %arg2[%c0, %c0_0, %c0_1] : memref<1x32x128xf32, #tpu.memory_space<vmem>>, vector<1x32x128xf32>
    %c0_2 = arith.constant 0 : index
    %c0_3 = arith.constant 0 : index
    %1 = vector.load %arg3[%c0_2, %c0_3] : memref<1x128xf32, #tpu.memory_space<vmem>>, vector<1x128xf32>
    %2 = vector.shape_cast %1 : vector<1x128xf32> to vector<1x1x128xf32>
    %3 = vector.broadcast %2 : vector<1x1x128xf32> to vector<1x32x128xf32>
    %4 = arith.mulf %0, %3 : vector<1x32x128xf32>
    %c0_4 = arith.constant 0 : index
    %c0_5 = arith.constant 0 : index
    %5 = vector.load %arg4[%c0_4, %c0_5] : memref<1x128xf32, #tpu.memory_space<vmem>>, vector<1x128xf32>
    %6 = vector.shape_cast %5 : vector<1x128xf32> to vector<1x1x128xf32>
    %7 = vector.broadcast %6 : vector<1x1x128xf32> to vector<1x32x128xf32>
    %8 = arith.addf %4, %7 : vector<1x32x128xf32>
    %c0_i32 = arith.constant 0 : i32
    %9 = arith.cmpi eq, %arg1, %c0_i32 : i32
    %10 = arith.extui %9 : i1 to i32
    %c0_i32_6 = arith.constant 0 : i32
    %11 = arith.cmpi ne, %10, %c0_i32_6 : i32
    scf.if %11 {
      %cst_59 = arith.constant 0.000000e+00 : f32
      %81 = vector.broadcast %cst_59 : f32 to vector<1x8x128xf32>
      %c0_60 = arith.constant 0 : index
      %c0_61 = arith.constant 0 : index
      %c0_62 = arith.constant 0 : index
      %82 = vector.load %arg9[%c0_60, %c0_61, %c0_62] : memref<1x40x128xf32, #tpu.memory_space<vmem>>, vector<1x8x128xf32>
      tpu.vector_store %arg9[%c0_60, %c0_61, %c0_62], %81 {strides = array<i32>} : memref<1x40x128xf32, #tpu.memory_space<vmem>>, vector<1x8x128xf32>,
    } else {
    }
    %c0_i32_7 = arith.constant 0 : i32
    %12 = arith.cmpi sgt, %arg1, %c0_i32_7 : i32
    %13 = arith.extui %12 : i1 to i32
    %c0_i32_8 = arith.constant 0 : i32
    %14 = arith.cmpi ne, %13, %c0_i32_8 : i32
    scf.if %14 {
      %c0_59 = arith.constant 0 : index
      %c32 = arith.constant 32 : index
      %c0_60 = arith.constant 0 : index
      %81 = vector.load %arg9[%c0_59, %c32, %c0_60] : memref<1x40x128xf32, #tpu.memory_space<vmem>>, vector<1x8x128xf32>
      %c0_61 = arith.constant 0 : index
      %c0_62 = arith.constant 0 : index
      %c0_63 = arith.constant 0 : index
      %82 = vector.load %arg9[%c0_61, %c0_62, %c0_63] : memref<1x40x128xf32, #tpu.memory_space<vmem>>, vector<1x8x128xf32>
      tpu.vector_store %arg9[%c0_61, %c0_62, %c0_63], %81 {strides = array<i32>} : memref<1x40x128xf32, #tpu.memory_space<vmem>>, vector<1x8x128xf32>,
    } else {
    }
    %c0_9 = arith.constant 0 : index
    %c8 = arith.constant 8 : index
    %c0_10 = arith.constant 0 : index
    %15 = vector.load %arg9[%c0_9, %c8, %c0_10] : memref<1x40x128xf32, #tpu.memory_space<vmem>>, vector<1x32x128xf32>
    tpu.vector_store %arg9[%c0_9, %c8, %c0_10], %8 {strides = array<i32>} : memref<1x40x128xf32, #tpu.memory_space<vmem>>, vector<1x32x128xf32>,
    %cst = arith.constant 0.000000e+00 : f32
    %16 = vector.broadcast %cst : f32 to vector<1x32x256xf32>
    %c0_11 = arith.constant 0 : index
    %c0_12 = arith.constant 0 : index
    %c0_13 = arith.constant 0 : index
    %17 = vector.load %arg9[%c0_11, %c0_12, %c0_13] : memref<1x40x128xf32, #tpu.memory_space<vmem>>, vector<1x32x128xf32>
    %c0_14 = arith.constant 0 : index
    %c0_15 = arith.constant 0 : index
    %c0_16 = arith.constant 0 : index
    %18 = vector.load %arg5[%c0_14, %c0_15, %c0_16] : memref<5x128x256xf32, #tpu.memory_space<vmem>>, vector<1x128x256xf32>
    %19 = vector.shape_cast %18 : vector<1x128x256xf32> to vector<128x256xf32>
    "tpu.trace_start"() <{level = 10 : i32, message = "blc,cn->bln"}> : () -> ()
    %cst_17 = arith.constant dense<0.000000e+00> : vector<1x32x256xf32>
    %20 = tpu.matmul %17, %19, %cst_17 {dimension_numbers = #tpu.dot_dimension_numbers<[2], [0], [0, 1], [1], [0, 0, 0, 1, 1, 1], [], []>} : vector<1x32x128xf32>, vector<128x256xf32>, vector<1x32x256xf32> -> vector<1x32x256xf32>
    "tpu.trace_stop"() : () -> ()
    %21 = arith.addf %16, %20 : vector<1x32x256xf32>
    %c0_18 = arith.constant 0 : index
    %c2 = arith.constant 2 : index
    %c0_19 = arith.constant 0 : index
    %22 = vector.load %arg9[%c0_18, %c2, %c0_19] : memref<1x40x128xf32, #tpu.memory_space<vmem>>, vector<1x32x128xf32>
    %c1 = arith.constant 1 : index
    %c0_20 = arith.constant 0 : index
    %c0_21 = arith.constant 0 : index
    %23 = vector.load %arg5[%c1, %c0_20, %c0_21] : memref<5x128x256xf32, #tpu.memory_space<vmem>>, vector<1x128x256xf32>
    %24 = vector.shape_cast %23 : vector<1x128x256xf32> to vector<128x256xf32>
    "tpu.trace_start"() <{level = 10 : i32, message = "blc,cn->bln"}> : () -> ()
    %cst_22 = arith.constant dense<0.000000e+00> : vector<1x32x256xf32>
    %25 = tpu.matmul %22, %24, %cst_22 {dimension_numbers = #tpu.dot_dimension_numbers<[2], [0], [0, 1], [1], [0, 0, 0, 1, 1, 1], [], []>} : vector<1x32x128xf32>, vector<128x256xf32>, vector<1x32x256xf32> -> vector<1x32x256xf32>
    "tpu.trace_stop"() : () -> ()
    %26 = arith.addf %21, %25 : vector<1x32x256xf32>
    %c0_23 = arith.constant 0 : index
    %c4 = arith.constant 4 : index
    %c0_24 = arith.constant 0 : index
    %27 = vector.load %arg9[%c0_23, %c4, %c0_24] : memref<1x40x128xf32, #tpu.memory_space<vmem>>, vector<1x32x128xf32>
    %c2_25 = arith.constant 2 : index
    %c0_26 = arith.constant 0 : index
    %c0_27 = arith.constant 0 : index
    %28 = vector.load %arg5[%c2_25, %c0_26, %c0_27] : memref<5x128x256xf32, #tpu.memory_space<vmem>>, vector<1x128x256xf32>
    %29 = vector.shape_cast %28 : vector<1x128x256xf32> to vector<128x256xf32>
    "tpu.trace_start"() <{level = 10 : i32, message = "blc,cn->bln"}> : () -> ()
    %cst_28 = arith.constant dense<0.000000e+00> : vector<1x32x256xf32>
    %30 = tpu.matmul %27, %29, %cst_28 {dimension_numbers = #tpu.dot_dimension_numbers<[2], [0], [0, 1], [1], [0, 0, 0, 1, 1, 1], [], []>} : vector<1x32x128xf32>, vector<128x256xf32>, vector<1x32x256xf32> -> vector<1x32x256xf32>
    "tpu.trace_stop"() : () -> ()
    %31 = arith.addf %26, %30 : vector<1x32x256xf32>
    %c0_29 = arith.constant 0 : index
    %c6 = arith.constant 6 : index
    %c0_30 = arith.constant 0 : index
    %32 = vector.load %arg9[%c0_29, %c6, %c0_30] : memref<1x40x128xf32, #tpu.memory_space<vmem>>, vector<1x32x128xf32>
    %c3 = arith.constant 3 : index
    %c0_31 = arith.constant 0 : index
    %c0_32 = arith.constant 0 : index
    %33 = vector.load %arg5[%c3, %c0_31, %c0_32] : memref<5x128x256xf32, #tpu.memory_space<vmem>>, vector<1x128x256xf32>
    %34 = vector.shape_cast %33 : vector<1x128x256xf32> to vector<128x256xf32>
    "tpu.trace_start"() <{level = 10 : i32, message = "blc,cn->bln"}> : () -> ()
    %cst_33 = arith.constant dense<0.000000e+00> : vector<1x32x256xf32>
    %35 = tpu.matmul %32, %34, %cst_33 {dimension_numbers = #tpu.dot_dimension_numbers<[2], [0], [0, 1], [1], [0, 0, 0, 1, 1, 1], [], []>} : vector<1x32x128xf32>, vector<128x256xf32>, vector<1x32x256xf32> -> vector<1x32x256xf32>
    "tpu.trace_stop"() : () -> ()
    %36 = arith.addf %31, %35 : vector<1x32x256xf32>
    %c0_34 = arith.constant 0 : index
    %c8_35 = arith.constant 8 : index
    %c0_36 = arith.constant 0 : index
    %37 = vector.load %arg9[%c0_34, %c8_35, %c0_36] : memref<1x40x128xf32, #tpu.memory_space<vmem>>, vector<1x32x128xf32>
    %c4_37 = arith.constant 4 : index
    %c0_38 = arith.constant 0 : index
    %c0_39 = arith.constant 0 : index
    %38 = vector.load %arg5[%c4_37, %c0_38, %c0_39] : memref<5x128x256xf32, #tpu.memory_space<vmem>>, vector<1x128x256xf32>
    %39 = vector.shape_cast %38 : vector<1x128x256xf32> to vector<128x256xf32>
    "tpu.trace_start"() <{level = 10 : i32, message = "blc,cn->bln"}> : () -> ()
    %cst_40 = arith.constant dense<0.000000e+00> : vector<1x32x256xf32>
    %40 = tpu.matmul %37, %39, %cst_40 {dimension_numbers = #tpu.dot_dimension_numbers<[2], [0], [0, 1], [1], [0, 0, 0, 1, 1, 1], [], []>} : vector<1x32x128xf32>, vector<128x256xf32>, vector<1x32x256xf32> -> vector<1x32x256xf32>
    "tpu.trace_stop"() : () -> ()
    %41 = arith.addf %36, %40 : vector<1x32x256xf32>
    %c0_41 = arith.constant 0 : index
    %c0_42 = arith.constant 0 : index
    %42 = vector.load %arg6[%c0_41, %c0_42] : memref<1x256xf32, #tpu.memory_space<vmem>>, vector<1x256xf32>
    %43 = vector.shape_cast %42 : vector<1x256xf32> to vector<1x1x256xf32>
    %44 = vector.broadcast %43 : vector<1x1x256xf32> to vector<1x32x256xf32>
    %45 = arith.addf %41, %44 : vector<1x32x256xf32>
    %46 = vector.extract_strided_slice %45 {offsets = [0, 0, 0], sizes = [1, 32, 128], strides = [1, 1, 1]} : vector<1x32x256xf32> to vector<1x32x128xf32>
    %47 = arith.negf %46 : vector<1x32x128xf32>
    %48 = math.exp %47 : vector<1x32x128xf32>
    %cst_43 = arith.constant 1.000000e+00 : f32
    %49 = vector.broadcast %cst_43 : f32 to vector<1x32x128xf32>
    %50 = arith.addf %49, %48 : vector<1x32x128xf32>
    %51 = arith.divf %49, %50 : vector<1x32x128xf32>
    %52 = vector.extract_strided_slice %45 {offsets = [0, 0, 128], sizes = [1, 32, 128], strides = [1, 1, 1]} : vector<1x32x256xf32> to vector<1x32x128xf32>
    %53 = math.tanh %52 : vector<1x32x128xf32>
    %54 = arith.mulf %51, %53 : vector<1x32x128xf32>
    %c0_44 = arith.constant 0 : index
    %c0_45 = arith.constant 0 : index
    %c0_46 = arith.constant 0 : index
    %55 = vector.load %arg7[%c0_44, %c0_45, %c0_46] : memref<1x32x128xf32, #tpu.memory_space<vmem>>, vector<1x32x128xf32>
    tpu.vector_store %arg7[%c0_44, %c0_45, %c0_46], %54 {strides = array<i32>} : memref<1x32x128xf32, #tpu.memory_space<vmem>>, vector<1x32x128xf32>,
    %c0_i32_47 = arith.constant 0 : i32
    %56 = arith.cmpi eq, %arg1, %c0_i32_47 : i32
    %57 = arith.extui %56 : i1 to i32
    %c0_i32_48 = arith.constant 0 : i32
    %58 = arith.cmpi ne, %57, %c0_i32_48 : i32
    scf.if %58 {
      %cst_59 = arith.constant 0.000000e+00 : f32
      %81 = vector.broadcast %cst_59 : f32 to vector<1x8x128xf32>
      %c0_60 = arith.constant 0 : index
      %c0_61 = arith.constant 0 : index
      %c0_62 = arith.constant 0 : index
      %82 = vector.load %arg8[%c0_60, %c0_61, %c0_62] : memref<1x8x128xf32, #tpu.memory_space<vmem>>, vector<1x8x128xf32>
      tpu.vector_store %arg8[%c0_60, %c0_61, %c0_62], %81 {strides = array<i32>} : memref<1x8x128xf32, #tpu.memory_space<vmem>>, vector<1x8x128xf32>,
    } else {
    }
    %59 = vector.shape_cast %54 : vector<1x32x128xf32> to vector<32x128xf32>
    %cst_49 = arith.constant dense<0.000000e+00> : vector<128xf32>
    %60 = vector.multi_reduction <add>, %59, %cst_49 [0] : vector<32x128xf32> to vector<128xf32>
    %61 = vector.shape_cast %60 : vector<128xf32> to vector<1x128xf32>
    %62 = arith.mulf %59, %59 : vector<32x128xf32>
    %cst_50 = arith.constant dense<0.000000e+00> : vector<128xf32>
    %63 = vector.multi_reduction <add>, %62, %cst_50 [0] : vector<32x128xf32> to vector<128xf32>
    %64 = vector.shape_cast %63 : vector<128xf32> to vector<1x128xf32>
    %65 = tpu.iota {dimensions = array<i32: 0>} : vector<8x128xi32>
    %c0_i32_51 = arith.constant 0 : i32
    %66 = vector.broadcast %c0_i32_51 : i32 to vector<8x128xi32>
    %67 = arith.cmpi eq, %65, %66 : vector<8x128xi32>
    %c1_i32 = arith.constant 1 : i32
    %68 = vector.broadcast %c1_i32 : i32 to vector<8x128xi32>
    %69 = arith.cmpi eq, %65, %68 : vector<8x128xi32>
    %cst_52 = arith.constant 0.000000e+00 : f32
    %70 = vector.shape_cast %64 : vector<1x128xf32> to vector<1x128xf32>
    %71 = vector.broadcast %70 : vector<1x128xf32> to vector<8x128xf32>
    %72 = vector.broadcast %cst_52 : f32 to vector<8x128xf32>
    %73 = arith.select %69, %71, %72 : vector<8x128xi1>, vector<8x128xf32>
    %74 = vector.shape_cast %61 : vector<1x128xf32> to vector<1x128xf32>
    %75 = vector.broadcast %74 : vector<1x128xf32> to vector<8x128xf32>
    %76 = arith.select %67, %75, %73 : vector<8x128xi1>, vector<8x128xf32>
    %c0_53 = arith.constant 0 : index
    %c0_54 = arith.constant 0 : index
    %c0_55 = arith.constant 0 : index
    %77 = vector.load %arg8[%c0_53, %c0_54, %c0_55] : memref<1x8x128xf32, #tpu.memory_space<vmem>>, vector<1x8x128xf32>
    %78 = vector.shape_cast %76 : vector<8x128xf32> to vector<1x8x128xf32>
    %79 = arith.addf %77, %78 : vector<1x8x128xf32>
    %c0_56 = arith.constant 0 : index
    %c0_57 = arith.constant 0 : index
    %c0_58 = arith.constant 0 : index
    %80 = vector.load %arg8[%c0_56, %c0_57, %c0_58] : memref<1x8x128xf32, #tpu.memory_space<vmem>>, vector<1x8x128xf32>
    tpu.vector_store %arg8[%c0_56, %c0_57, %c0_58], %79 {strides = array<i32>} : memref<1x8x128xf32, #tpu.memory_space<vmem>>, vector<1x8x128xf32>,
    return
  }
  func.func @transform_0(%arg0: i32, %arg1: i32) -> (i32, i32, i32) {
    %c0_i32 = arith.constant 0 : i32
    %c0_i32_0 = arith.constant 0 : i32
    return %arg0, %arg1, %c0_i32 : i32, i32, i32
  }
  func.func @transform_1(%arg0: i32, %arg1: i32) -> (i32, i32) {
    %c0_i32 = arith.constant 0 : i32
    %c0_i32_0 = arith.constant 0 : i32
    %c0_i32_1 = arith.constant 0 : i32
    return %c0_i32, %c0_i32_0 : i32, i32
  }
  func.func @transform_2(%arg0: i32, %arg1: i32) -> (i32, i32) {
    %c0_i32 = arith.constant 0 : i32
    %c0_i32_0 = arith.constant 0 : i32
    %c0_i32_1 = arith.constant 0 : i32
    return %c0_i32, %c0_i32_0 : i32, i32
  }
  func.func @transform_3(%arg0: i32, %arg1: i32) -> (i32, i32, i32) {
    %c0_i32 = arith.constant 0 : i32
    %c0_i32_0 = arith.constant 0 : i32
    %c0_i32_1 = arith.constant 0 : i32
    %c0_i32_2 = arith.constant 0 : i32
    return %c0_i32, %c0_i32_0, %c0_i32_1 : i32, i32, i32
  }
  func.func @transform_4(%arg0: i32, %arg1: i32) -> (i32, i32) {
    %c0_i32 = arith.constant 0 : i32
    %c0_i32_0 = arith.constant 0 : i32
    %c0_i32_1 = arith.constant 0 : i32
    return %c0_i32, %c0_i32_0 : i32, i32
  }
  func.func @transform_5(%arg0: i32, %arg1: i32) -> (i32, i32, i32) {
    %c0_i32 = arith.constant 0 : i32
    %c0_i32_0 = arith.constant 0 : i32
    return %arg0, %arg1, %c0_i32 : i32, i32, i32
  }
  func.func @transform_6(%arg0: i32, %arg1: i32) -> (i32, i32, i32) {
    %c0_i32 = arith.constant 0 : i32
    %c0_i32_0 = arith.constant 0 : i32
    %c0_i32_1 = arith.constant 0 : i32
    return %arg0, %c0_i32, %c0_i32_0 : i32, i32, i32
  }
}

</mosaic_0001>

<bundles_post_ra>
// kernel: _lambda_.5
= control target key start
LH: loop header
LB: loop body
LE: loop exit
PB: predicated region body
PF: predicated region fallthrough
CT: control target
= control target key end

     0   :  { %11 = vsyncpa [#allocation3], 0  ;;  %s1010_s0 = inlined_call_operand.vmem [shape: f32[4,128,128], index: 0, kind: input, shape index: {}]   ;;  %s1011_s1 = inlined_call_operand.vmem [shape: f32[4,128,12], index: 1, kind: input, shape index: {}]   ;;  %s1012_s2 = inlined_call_operand.vmem [shape: f32[1,128], index: 2, kind: input, shape index: {}]   ;;  %s1013_s3 = inlined_call_operand.vmem [shape: f32[1,128], index: 3, kind: input, shape index: {}]   ;;  %s1014_s4 = inlined_call_operand.vmem [shape: f32[12,128], index: 4, kind: input, shape index: {}]   ;;  %s1015_s5 = inlined_call_operand.vmem [shape: f32[1,128], index: 5, kind: input, shape index: {}]   ;;  %s1016_s6 = inlined_call_operand.hbm [shape: f32[4,128,128], index: 6, kind: output, shape index: {}]  }
   0x1   :  { %13 = vsyncpa [#allocation3 + $0x1], 0  ;;  %s845_s21 = smov 0   ;;  %s847_s22 = smov 0  }
   0x2   :  { %s849_s23 = smov 0   ;;  %s851_s24 = smov 0  }
   0x3   :  { %s853_s25 = smov 0   ;;  %s855_s26 = smov 0  }
   0x4   :  { %s857_s27 = smov 0   ;;  %s859_s28 = smov 0  }
   0x5 LB: > { %s586_s29 = sadd.s32 4294967295, %s804_s28   ;;  %s587_s30 = sadd.s32 4294967294, %s804_s28   ;;  %s804_s28 = sphi %s859_s28, %s19_s28   ;;  %s800_s27 = sphi %s857_s27, %s1025_s27   ;;  %s796_s26 = sphi %s855_s26, %s1024_s26   ;;  %s792_s25 = sphi %s853_s25, %s1023_s25   ;;  %s788_s24 = sphi %s851_s24, %s1022_s24   ;;  %s784_s23 = sphi %s849_s23, %s1021_s23   ;;  %s780_s22 = sphi %s847_s22, %s1020_s22   ;;  %s776_s21 = sphi %s845_s21, %s1019_s21  }
   0x6   : > { %s28_s7 = sadd.s32 1, %s796_s26  ;;  %s31_s8 = sadd.s32 1, %s800_s27 }
   0x7   : > { %p29_p0 = scmp.ge.s32.totalorder %s28_s7, 4  ;;  %p190_p1 = scmp.ne.s32.totalorder %s784_s23, %s780_s22 }
   0x8   : > { %p191_p2 = scmp.eq.s32.totalorder %s586_s29, 15  ;;  %p196_p5 = scmp.ne.s32.totalorder %s780_s22, %s776_s21 }
   0x9   : > { %s1027_s7 = smov (%p29_p0, %s28_s7), 0  ;;  %s1029_s8 = smov (!%p29_p0, %s31_s8), %s800_s27 }
   0xa   : > { %s176_s9 = ssub.s32 %s796_s26, %s1027_s7  ;;  %p896_p3 = por %p191_p2, %p190_p1 }
   0xb   : > { %p33_p4 = scmp.ge.s32.totalorder %s1029_s8, 4  ;;  %p197_p6 = scmp.eq.s32.totalorder %s587_s30, 15 }
   0xc   : > { %p590_p7 = scmp.ge.s32.totalorder %s804_s28, 1  ;;  %p253_p9 = scmp.lt.s32.totalorder %s804_s28, 17 }
   0xd   : > { %s1031_s8 = smov (%p33_p4, %s1029_s8), 0  ;;  %p905_p8 = por %p197_p6, %p196_p5 }
   0xe   : > { %s175_s12 = ssub.s32 %s800_s27, %s1031_s8  ;;  %s180_s13 = sadd.s32 1, %s784_s23 }
   0xf   : > { %s177_s14 = sor.u32 %s176_s9, %s175_s12  ;;  %p254_p10 = pnand %p590_p7, %p253_p9 }
  0x10   : > { %p178_p11 = scmp.eq.s32.totalorder %s177_s14, 0  ;;  %v321_v0 = vld [vmem:[%s1014_s4] sm:$0xff] (!%p254_p10)  ;;  %v322_v1 = vld [vmem:[%s1014_s4 + $0x8] sm:$0xf] (!%p254_p10)  ;;  %vm336_vm0 = vcmask (!%p254_p10), 1043456   ;;  %s923_s20 = sshll.u32 (!%p254_p10), %s788_s24, 2 }
  0x11   : > { %257 = sbr.rel (%p254_p10) target bundleno = 264 (0x108), region = 44  ;;  %v628_v2 = vpack.c.bf16 (!%p254_p10), %v322_v1, %v321_v0  ;;  %vm806_vm1 = vmmov (!%p254_p10), 1   ;;  %p297_p12 = scmp.lt.s32.totalorder (!%p254_p10), %s792_s25, 3  ;;  %vm323_vm3 = vcmask (!%p254_p10), 97280   ;;  %v603_v8 = vld [vmem:[%s1012_s2] ss:$0 sm:$0xff] (!%p254_p10) }
  0x12   : > { %s914_s15 = scalar_select %p178_p11, %s784_s23, %s180_s13  }
  0x13   : > { %vm629_vm2 = vmpackc.low (!%p254_p10), %vm336_vm0, %vm806_vm1  ;;  %p299_p13 = scmp.lt.s32.totalorder (!%p254_p10), %s923_s20, 15  ;;  %v604_v14 = vld [vmem:[%s1013_s3] ss:$0 sm:$0xff] (!%p254_p10) }
  0x14   : > { %630 = vmatprep.subr.msk.bf16.mxu0 (!%p254_p10), %vm629_vm2, %v628_v2  ;;  %634 = vmatprep.subr.msk.bf16.mxu1 (!%p254_p10), %vm629_vm2, %v628_v2  ;;  %v605_v22 = vld [vmem:[%s1015_s5] ss:$0 sm:$0xff] (!%p254_p10) }
  0x15   : > { %633 = vmatpush3.bf16.msk.msra.mxu0 (!%p254_p10), %vm629_vm2, %v628_v2  ;;  %635 = vmatpush3.bf16.msk.msra.mxu1 (!%p254_p10), %vm629_vm2, %v628_v2 }
  0x18   : > { %s298_s29 = scalar_select %p297_p12, %s792_s25, 3 }
  0x19   : > { %s300_s30 = scalar_select %p299_p13, %s923_s20, 15 }
  0x1a   : > { %s593_s9 = sshll.u32 %s298_s29, 4 }
  0x1b   : > { %s302_s12 = sadd.s32 %s593_s9, %s300_s30  ;;  %s293_s9 = sand.u32 1, %s780_s22  }
  0x1c   : > { %s594_s13 = sshll.u32 %s302_s12, 3  ;;  %s608_s12 = sshll.u32 %s792_s25, 4 }
  0x1d   : > { %s314_s16 = scalar_lea.vmem %s1011_s1, %s594_s13  ;;  %s304_s19 = scalar_lea.vmem %s1010_s0, %s594_s13 }
  0x1e   : > { %v317_v3 = vld [vmem:[%s314_s16] sm:$0xff]  ;;  %v319_v4 = vld [vmem:[%s314_s16 + $0x10] sm:$0xff]  ;;  %v318_v5 = vld [vmem:[%s314_s16 + $0x8] sm:$0xff]  ;;  %s591_s24 = sshll.u32 %s293_s9, 5  ;;  %s483_s13 = sadd.s32 %s608_s12, %s923_s20 }
  0x1f   : > { %622 = vmatprep.mubr.msk.f32.mxu0 %vm323_vm3, %v317_v3  ;;  %625 = vmatprep.mubr.msk.f32.mxu1 %vm323_vm3, %v319_v4  ;;  %v320_v6 = vld [vmem:[%s314_s16 + $0x18] sm:$0xff]  ;;  %v426_v7 = vld [vmem:[%s304_s19 + $0x8] sm:$0xff]  ;;  %v425_v10 = vld [vmem:[%s304_s19] sm:$0xff]  ;;  %s609_s17 = sshll.u32 %s483_s13, 7  ;;  %s295_s25 = scalar_lea.vmem [#allocation2], %s591_s24 }
  0x20   : > { %623 = vmatmul.mubr.msk.f32.vlgmr.msra.gmra.mrb[0].mxu0 %vm323_vm3, %v318_v5  ;;  %626 = vmatmul.mubr.msk.f32.vlgmr.msra.gmra.mrb[0].mxu1 %vm323_vm3, %v320_v6  ;;  %v428_v9 = vld [vmem:[%s304_s19 + $0x18] sm:$0xff]  ;;  %v427_v11 = vld [vmem:[%s304_s19 + $0x10] sm:$0xff]  ;;  %v437_v12 = vmul.f32 %v603_v8, %v426_v7  ;;  %v436_v15 = vmul.f32 %v603_v8, %v425_v10  ;;  %s486_s29 = sshll.u32 %s295_s25, 4  ;;  %s952_s12 = scalar_lea.hbm %s1016_s6, %s609_s17  ;;  %s954_s29 = int_to_ptr.vmem [resolvable:$true] %s486_s29 }
  0x21   : > { %v439_v13 = vmul.f32 %v603_v8, %v428_v9  ;;  %v438_v16 = vmul.f32 %v603_v8, %v427_v11  ;;  %s958_s24 = scalar_lea.sflag [#allocation3], %s293_s9  ;;  %s710_s14 = scalar_lea.vmem %s954_s29, 512 }
  0x22   : > { %v448_v17 = vadd.f32 %v604_v14, %v437_v12  ;;  %v447_v19 = vadd.f32 %v604_v14, %v436_v15  ;;  %p711_p0 = scmp.ne.s32.totalorder %s954_s29, %s710_s14  ;;  %s807_s16 = smov [#allocation2]  }
  0x23   : > { %v450_v18 = vadd.f32 %v604_v14, %v439_v13  ;;  %v449_v20 = vadd.f32 %v604_v14, %v438_v16  ;;  %s714_s13 = sshll.u32 %s807_s16, 4  ;;  %s715_s13 = int_to_ptr.vmem [resolvable:$false] %s714_s13 }
  0x24   : > { %p712_p1 = pnand %p711_p0, %p896_p3  ;;  %s716_s17 = scalar_lea.vmem %s715_s13, 1024 }
  0x25   : > { %p717_p4 = scmp.lt.s32.totalorder %s954_s29, %s715_s13  ;;  %p718_p5 = scmp.lt.s32.totalorder %s716_s17, %s710_s14 }
  0x26   : > { %p713_p2 = pneg %p712_p1 }
  0x27   : > { %p719_p6 = por %p718_p5, %p717_p4 }
  0x29   : > { %p720_p7 = pnand %p719_p6, %p713_p2 }
  0xf3   : > { %v624_v21 = vpop.f32.mrb[0].mxu0  ;;  %v627_v23 = vpop.f32.mrb[0].mxu1 }
  0xf4   : > { %v452_v24 = vadd.f32 %v624_v21, %v448_v17  ;;  %v454_v25 = vadd.f32 %v627_v23, %v450_v18  ;;  %v406_v26 = vpop.f32.mrb[1].mxu0  ;;  %v416_v27 = vpop.f32.mrb[1].mxu1 }
  0xf5   : > { %v451_v28 = vadd.f32 %v447_v19, %v406_v26  ;;  %v453_v29 = vadd.f32 %v449_v20, %v416_v27 }
  0xf6   : > { %v463_v30 = vadd.f32 %v605_v22, %v452_v24  ;;  %v465_v31 = vadd.f32 %v605_v22, %v454_v25 }
  0xf7   : > { %v462_v32 = vadd.f32 %v605_v22, %v451_v28  ;;  %v464_v33 = vadd.f32 %v605_v22, %v453_v29 }
  0xf8   : > { %467 = vst [vmem:[%s295_s25 + $0x8] sm:$0xff] %v463_v30  ;;  %469 = vst [vmem:[%s295_s25 + $0x18] sm:$0xff] %v465_v31 }
  0xf9   : > { %466 = vst [vmem:[%s295_s25] sm:$0xff] %v462_v32  ;;  %468 = vst [vmem:[%s295_s25 + $0x10] sm:$0xff] %v464_v33 }
  0xfa   : > { %723 = shalt.err (!%p720_p7)
}
  0xfb   : > { %s724_s9 = scalar_lea.hbm %s952_s12, 512  ;;  %s728_s25 = scalar_lea.hbm %s1016_s6, 8192 }
  0xfc   : > { %p725_p9 = scmp.ne.s32.totalorder %s952_s12, %s724_s9  ;;  %p729_p12 = scmp.lt.u32.totalorder %s952_s12, %s1016_s6 }
  0xfd   : > { %p730_p13 = scmp.lt.u32.totalorder %s728_s25, %s724_s9  ;;  %p732_p1 = scmp.lt.u32.totalorder %s724_s9, %s952_s12 }
  0xfe   : > { %p726_p10 = pnand %p725_p9, %p896_p3 }
  0xff   : > { %p731_p0 = por %p730_p13, %p729_p12 }
 0x100   : > { %p727_p11 = pneg %p726_p10 }
 0x101   : > { %p733_p2 = por %p732_p1, %p731_p0 }
 0x103   : > { %p734_p4 = pnand %p733_p2, %p727_p11 }
 0x105   : > { %737 = shalt.err (!%p734_p4)
}
 0x106   : > { %s808_s14 = smov 128   ;;  %s809_s16 = smov 8  }
 0x107   : > { %636 = dma.vmem_to_hbm [thread:$0]  (%p896_p3), %s954_s29, 512, %s952_s12, %s958_s24, %s808_s14, %s808_s14, %s809_s16  }
 0x108 PF: > { %p642_p5 = scmp.ge.s32.totalorder %s804_s28, 2  ;;  %s501_s13 = sand.u32 1, %s776_s21  }
 0x109   : > { %s502_s17 = scalar_lea.sflag [#allocation3], %s501_s13 }
 0x10a   : > { %p639_p6 = pnand %p642_p5, %p905_p8 }
 0x10c   : > { %771 = dma.done.wait (!%p639_p6), %s502_s17, 512  }
 0x10d   : > { %773 = vsyncadd (!%p639_p6), %s502_s17, 4294966784  ;;  %s19_s28 = sadd.s32 1, %s804_s28   ;;  %s1019_s21 = smov %s780_s22 }
 0x10e   : > { %p16_p7 = scmp.ge.s32.totalorder %s19_s28, 18   ;;  %s1020_s22 = smov %s784_s23 }
 0x10f   : > { %s1021_s23 = smov %s914_s15  ;;  %s1022_s24 = smov %s796_s26 }
 0x110   : > { %s1023_s25 = smov %s800_s27  ;;  %s1024_s26 = smov %s1027_s7 }
 0x111   : > { %s1025_s27 = smov %s1031_s8  ;;  %18 = sbr.rel (!%p16_p7) target bundleno = 5 (0x5), region = 82 }
 0x118   :  { %507 = vsyncpa [#allocation3], 1 }
 0x119   :  { %509 = vsyncpa [#allocation3 + $0x1], 1 }

// kernel: _lambda_.3
= control target key start
LH: loop header
LB: loop body
LE: loop exit
PB: predicated region body
PF: predicated region fallthrough
CT: control target
= control target key end

     0   :  { %10 = vsyncpa [#allocation4], 0  ;;  %s1415_s15 = smov 0   ;;  %s1417_s16 = smov 0   ;;  %s1613_s0 = inlined_call_operand.vmem [shape: f32[4,128,12], index: 0, kind: input, shape index: {}]   ;;  %s1614_s1 = inlined_call_operand.hbm [shape: f32[5,12,256], index: 1, kind: input, shape index: {}]   ;;  %s1615_s2 = inlined_call_operand.vmem [shape: f32[1,256], index: 2, kind: input, shape index: {}]   ;;  %s1616_s3 = inlined_call_operand.vmem [shape: f32[4,128,128], index: 3, kind: output, shape index: {0}]   ;;  %s1617_s4 = inlined_call_operand.vmem [shape: f32[4,8,128], index: 4, kind: output, shape index: {1}]  }
   0x1   :  { %s1419_s17 = smov 0   ;;  %s1421_s18 = smov 0  }
   0x2   :  { %s1423_s19 = smov 0  }
   0x3 LB: > { %s1113_s20 = sadd.s32 4294967295, %s1381_s19   ;;  %s25_s21 = sadd.s32 1, %s1373_s17  ;;  %s1381_s19 = sphi %s1423_s19, %s16_s19   ;;  %s1377_s18 = sphi %s1421_s18, %s1631_s18   ;;  %s1373_s17 = sphi %s1419_s17, %s1630_s17   ;;  %s1369_s16 = sphi %s1417_s16, %s1629_s16   ;;  %s1365_s15 = sphi %s1415_s15, %s1628_s15  }
   0x4   : > { %p26_p0 = scmp.ge.s32.totalorder %s25_s21, 4  ;;  %s28_s22 = sadd.s32 1, %s1377_s18 }
   0x5   : > { %p1115_p1 = scmp.ge.s32.totalorder %s1381_s19, 1  ;;  %p157_p2 = scmp.lt.s32.totalorder %s1381_s19, 17 }
   0x6   : > { %s1633_s21 = smov (%p26_p0, %s25_s21), 0  ;;  %s1635_s22 = smov (!%p26_p0, %s28_s22), %s1377_s18 }
   0x7   : > { %p1448_p3 = pnand %p1115_p1, %p157_p2  ;;  %p30_p4 = scmp.ge.s32.totalorder %s1635_s22, 4 }
   0x8   : > { %p1452_p5 = scmp.eq.s32.totalorder %s1113_s20, 0  ;;  %s1383_s25 = smov [#allocation3]  }
   0x9   : > { %s1621_s23 = scalar_select %p1448_p3, 1, 0 }
   0xa   : > { %s1622_s24 = scalar_select %p1452_p5, 1, 0 }
   0xb   : > { %p1234_p6 = pneg %p1448_p3  ;;  %s1637_s22 = smov (%p30_p4, %s1635_s22), 0 }
   0xc   : > { %s169_s26 = sshll.u32 %s1383_s25, 4  ;;  %s1311_s30 = scalar_lea.hbm %s1614_s1, 2560  ;;  %s170_s26 = int_to_ptr.vmem [resolvable:$true] %s169_s26 }
   0xd   : > { %p1462_p7 = pnand %p1452_p5, %p1234_p6  ;;  %p1312_p8 = scmp.ne.s32.totalorder %s1614_s1, %s1311_s30 }
   0xe   : > { %p1318_p12 = scmp.lt.u32.totalorder %s1311_s30, %s1614_s1 }
   0xf   : > { %p1313_p9 = pneg %p1462_p7 }
  0x11   : > { %p1314_p10 = pnand %p1313_p9, %p1312_p8 }
  0x13   : > { %p1315_p11 = pneg %p1314_p10 }
  0x15   : > { %p1320_p13 = pnand %p1318_p12, %p1315_p11 }
  0x17   : > { %1323 = shalt.err (!%p1320_p13)
}
  0x18   : > { %s1324_s9 = scalar_lea.vmem %s170_s26, 2560  ;;  %p1332_p4 = scmp.lt.s32.totalorder %s170_s26, %s170_s26 }
  0x19   : > { %p1325_p0 = scmp.ne.s32.totalorder %s170_s26, %s1324_s9  ;;  %p1333_p6 = scmp.lt.s32.totalorder %s1324_s9, %s1324_s9 }
  0x1b   : > { %p1327_p1 = pnand %p1325_p0, %p1313_p9  ;;  %p1334_p5 = por %p1333_p6, %p1332_p4 }
  0x1d   : > { %p1328_p2 = pneg %p1327_p1 }
  0x1f   : > { %p1335_p3 = pnand %p1334_p5, %p1328_p2 }
  0x21   : > { %1338 = shalt.err (!%p1335_p3)
}
  0x22   : > { %s1384_s10 = smov 256   ;;  %s1385_s11 = smov 16  }
  0x23   : > { %1237 = dma.hbm_to_vmem [thread:$0]  (!%p1462_p7), %s1614_s1, 2560, %s170_s26, [#allocation4], %s1384_s10, %s1384_s10, %s1385_s11  }
  0x24   : > { %p1624_p8 = scmp.ne.s32.totalorder %s1621_s23, 0 }
  0x25   : > { %p1625_p10 = scmp.ne.s32.totalorder (!%p1624_p8), %s1622_s24, 0 }
  0x26   : > { %201 = sbr.rel (%p1624_p8) target bundleno = 386 (0x182), region = 32 }
  0x2d   : > { %1360 = dma.done.wait (%p1625_p10), [#allocation4], 2560  }
  0x2e   : > { %1362 = vsyncadd (%p1625_p10), [#allocation4], 4294964736  ;;  %s1120_s14 = sshll.u32 %s1365_s15, 2  ;;  %p240_p3 = scmp.lt.s32.totalorder %s1369_s16, 3 }
  0x2f   : > { %p242_p5 = scmp.lt.s32.totalorder %s1120_s14, 15  ;;  %p1127_p7 = scmp.ne.s32.totalorder %s1365_s15, 0 }
  0x30   : > { %s1639_s16 = smov (!%p240_p3, %s1369_s16), 3  ;;  %vm271_vm0 = vcmask (!%p1127_p7), 93184   ;;  %v1386_v4 = vmov (!%p1127_p7), 0.0  }
  0x31   : > { %s1641_s14 = smov (!%p242_p5, %s1120_s14), 15  ;;  %s1121_s20 = sshll.u32 %s1639_s16, 4  ;;  %272 = vst.msk [vmem:[#allocation2] sm:$0xf] (!%p1127_p7), %vm271_vm0, %v1386_v4 }
  0x32   : > { %s1126_s25 = sshll.u32 %s1639_s16, 3  ;;  %s245_s26 = sadd.s32 %s1121_s20, %s1641_s14 }
  0x33   : > { %s1494_s28 = scalar_lea.vmem %s1617_s4, %s1126_s25  ;;  %s1122_s29 = sshll.u32 %s245_s26, 3 }
  0x34   : > { %s247_s5 = scalar_lea.vmem %s1613_s0, %s1122_s29  ;;  %s1502_s8 = scalar_lea.vmem %s1616_s3, %s1122_s29 }
  0x35   : > { %v263_v0 = vld [vmem:[%s247_s5] sm:$0xff]  ;;  %v264_v1 = vld [vmem:[%s247_s5 + $0x8] sm:$0xff]  ;;  %v265_v2 = vld [vmem:[%s247_s5 + $0x10] sm:$0xff]  ;;  %270 = sbr.rel (%p1127_p7) target bundleno = 60 (0x3c), region = 40 }
  0x36   : > { %v266_v3 = vld [vmem:[%s247_s5 + $0x18] sm:$0xff] }
  0x3c PF: > { %p1128_p9 = scmp.le.s32.totalorder %s1365_s15, 0 }
  0x3d   : > { %v277_v5 = vld [vmem:[#allocation2 + $0x20] sm:$0xf] (!%p1128_p9)  ;;  %vm278_vm1 = vcmask (!%p1128_p9), 93184  }
  0x3e   : > { %276 = sbr.rel (%p1128_p9) target bundleno = 69 (0x45), region = 44  ;;  %279 = vst.msk [vmem:[#allocation2] sm:$0xf] (!%p1128_p9), %vm278_vm1, %v277_v5 }
  0x45 PF: > { %v299_v6 = vld [vmem:[#allocation3 + $0x28] sm:$0xff]  ;;  %v301_v7 = vld [vmem:[#allocation3 + $0x38] sm:$0xf]  ;;  %vm314_vm2 = vcmask 1043456   ;;  %vm1387_vm3 = vmmov 1   ;;  %v298_v12 = vld [vmem:[#allocation3 + $0x20] sm:$0xff]  ;;  %v891_v58 = vlaneseq }
  0x46   : > { %v523_v8 = vld [vmem:[#allocation3 + $0x48] sm:$0xff]  ;;  %v1166_v9 = vpack.c.bf16 %v301_v7, %v299_v6  ;;  %vm1508_vm4 = vmpackc.low %vm314_vm2, %vm1387_vm3  ;;  %v525_v11 = vld [vmem:[#allocation3 + $0x58] sm:$0xf]  ;;  %vm280_vm5 = vcmask 97280   ;;  %v1388_v17 = vmov 0.0  }
  0x47   : > { %v1178_v13 = vpack.c.bf16 %v525_v11, %v523_v8  ;;  %v300_v14 = vld [vmem:[#allocation3 + $0x30] sm:$0xf]  ;;  %v522_v15 = vld [vmem:[#allocation3 + $0x40] sm:$0xff]  ;;  %385 = vmatprep.mubr.f32.mxu1 %v1388_v17  ;;  %608 = vmatprep.mubr.f32.mxu0 %v1388_v17  ;;  %281 = vst.msk [vmem:[#allocation2 + $0x4] sm:$0xff] %vm280_vm5, %v263_v0  ;;  %282 = vst.msk [vmem:[#allocation2 + $0xc] sm:$0xff] %vm280_vm5, %v264_v1  ;;  %v1580_v59 = vshrl.u32 %v891_v58, 7 }
  0x48   : > { %v524_v16 = vld [vmem:[#allocation3 + $0x50] sm:$0xf]  ;;  %283 = vst.msk [vmem:[#allocation2 + $0x14] sm:$0xff] %vm280_vm5, %v265_v2  ;;  %284 = vst.msk [vmem:[#allocation2 + $0x1c] sm:$0xff] %vm280_vm5, %v266_v3  ;;  %1168 = vmatprep.subr.msk.bf16.mxu1 %vm1508_vm4, %v1166_v9  ;;  %v1169_v18 = vpack.c.bf16 %v300_v14, %v298_v12  ;;  %v290_v20 = vld [vmem:[#allocation3 + $0x8] sm:$0xff] }
  0x49   : > { %v1181_v19 = vpack.c.bf16 %v524_v16, %v522_v15  ;;  %v292_v21 = vld [vmem:[#allocation3 + $0x18] sm:$0xf]  ;;  %v647_v22 = vld [vmem:[#allocation3 + $0x68] sm:$0xff]  ;;  %1180 = vmatprep.subr.msk.bf16.mxu0 %vm1508_vm4, %v1178_v13  ;;  %v289_v25 = vld [vmem:[#allocation3] sm:$0xff]  ;;  %v893_v62 = vsub.s32 0, %v1580_v59  ;;  %v897_v12 = vsub.s32 1, %v1580_v59 }
  0x4a   : > { %v1172_v23 = vpack.c.bf16 %v292_v21, %v290_v20  ;;  %v649_v24 = vld [vmem:[#allocation3 + $0x78] sm:$0xf]  ;;  %v291_v26 = vld [vmem:[#allocation3 + $0x10] sm:$0xf]  ;;  %1171 = vmatpush1.bf16.msk.msra.mxu1 %vm1508_vm4, %v1169_v18  ;;  %v646_v28 = vld [vmem:[#allocation3 + $0x60] sm:$0xff] }
  0x4b   : > { %1183 = vmatpush1.bf16.msk.msra.mxu0 %vm1508_vm4, %v1181_v19  ;;  %v1184_v27 = vpack.c.bf16 %v649_v24, %v647_v22  ;;  %v648_v29 = vld [vmem:[#allocation3 + $0x70] sm:$0xf]  ;;  %v771_v30 = vld [vmem:[#allocation3 + $0x88] sm:$0xff]  ;;  %v773_v31 = vld [vmem:[#allocation3 + $0x98] sm:$0xf]  ;;  %v1175_v32 = vpack.c.bf16 %v291_v26, %v289_v25 }
  0x4c   : > { %1174 = vmatprep.subr.msk.bf16.mxu1 %vm1508_vm4, %v1172_v23  ;;  %v1187_v33 = vpack.c.bf16 %v648_v29, %v646_v28  ;;  %v1190_v36 = vpack.c.bf16 %v773_v31, %v771_v30  ;;  %v770_v39 = vld [vmem:[#allocation3 + $0x80] sm:$0xff]  ;;  %v772_v40 = vld [vmem:[#allocation3 + $0x90] sm:$0xf]  ;;  %v889_v0 = vld [vmem:[%s1615_s2] sm:$0x3] }
  0x4d   : > { %1186 = vmatprep.subr.msk.bf16.mxu0 %vm1508_vm4, %v1184_v27  ;;  %v1193_v43 = vpack.c.bf16 %v772_v40, %v770_v39  ;;  %v894_v2 = vrot.slane %v889_v0, %v893_v62  ;;  %v898_v21 = vrot.slane %v889_v0, %v897_v12 }
  0x4e   : > { %v293_v34 = vld [vmem:[#allocation2 + $0x1] sm:$0xff]  ;;  %v294_v37 = vld [vmem:[#allocation2 + $0x9] sm:$0xff] }
  0x4f   : > { %v517_v35 = vld [vmem:[#allocation2 + $0x2] sm:$0xff]  ;;  %1131 = vmatmul.mubr.msk.f32.vlgmr.msra.gmra.mrb[0].mxu1 %vm280_vm5, %v293_v34  ;;  %v518_v38 = vld [vmem:[#allocation2 + $0xa] sm:$0xff]  ;;  %v296_v44 = vld [vmem:[#allocation2 + $0x19] sm:$0xff] }
  0x50   : > { %1143 = vmatmul.mubr.msk.f32.vlgmr.msra.gmra.mrb[0].mxu0 %vm280_vm5, %v517_v35  ;;  %1177 = vmatpush1.bf16.msk.msra.mxu1 %vm1508_vm4, %v1175_v32  ;;  %v295_v41 = vld [vmem:[#allocation2 + $0x11] sm:$0xff]  ;;  %v641_v42 = vld [vmem:[#allocation2 + $0x3] sm:$0xff]  ;;  %v644_v49 = vld [vmem:[#allocation2 + $0x1b] sm:$0xff] }
  0x51   : > { %1189 = vmatpush1.bf16.msk.msra.mxu0 %vm1508_vm4, %v1187_v33  ;;  %391 = vmatprep.mubr.f32.mxu1 %v1388_v17  ;;  %v642_v45 = vld [vmem:[#allocation2 + $0xb] sm:$0xff]  ;;  %v285_v46 = vld [vmem:[#allocation2] sm:$0xff]  ;;  %v643_v47 = vld [vmem:[#allocation2 + $0x13] sm:$0xff] }
  0x52   : > { %614 = vmatprep.mubr.f32.mxu0 %v1388_v17  ;;  %1192 = vmatprep.subr.msk.bf16.mxu0 %vm1508_vm4, %v1190_v36  ;;  %v286_v48 = vld [vmem:[#allocation2 + $0x8] sm:$0xff]  ;;  %v287_v50 = vld [vmem:[#allocation2 + $0x10] sm:$0xff]  ;;  %v288_v52 = vld [vmem:[#allocation2 + $0x18] sm:$0xff] }
  0x53   : > { %1196 = vmatprep.subr.msk.bf16.mxu1 %vm1508_vm4, %v1178_v13  ;;  %1132 = vmatmul.mubr.msk.f32.gmra.mrb[2].mxu1 %vm280_vm5, %v294_v37  ;;  %v765_v51 = vld [vmem:[#allocation2 + $0x4] sm:$0xff]  ;;  %v766_v53 = vld [vmem:[#allocation2 + $0xc] sm:$0xff]  ;;  %v767_v55 = vld [vmem:[#allocation2 + $0x14] sm:$0xff] }
  0x54   : > { %1144 = vmatmul.mubr.msk.f32.gmra.mrb[2].mxu0 %vm280_vm5, %v518_v38  ;;  %397 = vmatprep.mubr.f32.mxu1 %v1388_v17  ;;  %v519_v54 = vld [vmem:[#allocation2 + $0x12] sm:$0xff]  ;;  %v520_v56 = vld [vmem:[#allocation2 + $0x1a] sm:$0xff] }
  0x55   : > { %732 = vmatprep.mubr.f32.mxu0 %v1388_v17  ;;  %v768_v57 = vld [vmem:[#allocation2 + $0x1c] sm:$0xff] }
  0x57   : > { %1133 = vmatmul.mubr.msk.f32.gmra.mrb[4].mxu1 %vm280_vm5, %v295_v41 }
  0x58   : > { %1149 = vmatmul.mubr.msk.f32.vlgmr.msra.gmra.mrb[0].mxu0 %vm280_vm5, %v641_v42  ;;  %403 = vmatprep.mubr.f32.mxu1 %v1388_v17 }
  0x59   : > { %1195 = vmatpush1.bf16.msk.msra.mxu0 %vm1508_vm4, %v1193_v43  ;;  %738 = vmatprep.mubr.f32.mxu0 %v1388_v17 }
  0x5b   : > { %1134 = vmatmul.mubr.msk.f32.gmra.mrb[6].mxu1 %vm280_vm5, %v296_v44 }
  0x5c   : > { %1150 = vmatmul.mubr.msk.f32.gmra.mrb[2].mxu0 %vm280_vm5, %v642_v45  ;;  %492 = vmatprep.mubr.f32.mxu1 %v1388_v17 }
  0x5d   : > { %744 = vmatprep.mubr.f32.mxu0 %v1388_v17 }
  0x5f   : > { %1137 = vmatmul.mubr.msk.f32.vlgmr.msra.gmra.mrb[0].mxu1 %vm280_vm5, %v285_v46 }
  0x60   : > { %1151 = vmatmul.mubr.msk.f32.gmra.mrb[4].mxu0 %vm280_vm5, %v643_v47  ;;  %1197 = vmatpush1.bf16.msk.msra.mxu1 %vm1508_vm4, %v1181_v19 }
  0x61   : > { %498 = vmatprep.mubr.f32.mxu1 %v1388_v17  ;;  %750 = vmatprep.mubr.f32.mxu0 %v1388_v17 }
  0x63   : > { %1138 = vmatmul.mubr.msk.f32.gmra.mrb[2].mxu1 %vm280_vm5, %v286_v48 }
  0x64   : > { %1152 = vmatmul.mubr.msk.f32.gmra.mrb[6].mxu0 %vm280_vm5, %v644_v49  ;;  %504 = vmatprep.mubr.f32.mxu1 %v1388_v17 }
  0x65   : > { %856 = vmatprep.mubr.f32.mxu0 %v1388_v17 }
  0x67   : > { %1139 = vmatmul.mubr.msk.f32.gmra.mrb[4].mxu1 %vm280_vm5, %v287_v50 }
  0x68   : > { %1155 = vmatmul.mubr.msk.f32.vlgmr.msra.gmra.mrb[0].mxu0 %vm280_vm5, %v765_v51  ;;  %510 = vmatprep.mubr.f32.mxu1 %v1388_v17 }
  0x69   : > { %862 = vmatprep.mubr.f32.mxu0 %v1388_v17 }
  0x6b   : > { %1140 = vmatmul.mubr.msk.f32.gmra.mrb[6].mxu1 %vm280_vm5, %v288_v52 }
  0x6c   : > { %1156 = vmatmul.mubr.msk.f32.gmra.mrb[2].mxu0 %vm280_vm5, %v766_v53  ;;  %620 = vmatprep.mubr.f32.mxu1 %v1388_v17 }
  0x6d   : > { %868 = vmatprep.mubr.f32.mxu0 %v1388_v17 }
  0x6f   : > { %1145 = vmatmul.mubr.msk.f32.vlgmr.msra.gmra.mrb[4].mxu1 %vm280_vm5, %v519_v54 }
  0x70   : > { %1157 = vmatmul.mubr.msk.f32.gmra.mrb[4].mxu0 %vm280_vm5, %v767_v55  ;;  %626 = vmatprep.mubr.f32.mxu1 %v1388_v17 }
  0x71   : > { %874 = vmatprep.mubr.f32.mxu0 %v1388_v17 }
  0x73   : > { %1146 = vmatmul.mubr.msk.f32.gmra.mrb[6].mxu1 %vm280_vm5, %v520_v56 }
  0x74   : > { %1158 = vmatmul.mubr.msk.f32.gmra.mrb[6].mxu0 %vm280_vm5, %v768_v57  ;;  %v1389_v57 = vmov (!%p1127_p7), 0.0  }
  0x75   : > { %948 = vst [vmem:[%s1494_s28] sm:$0xff] (!%p1127_p7), %v1389_v57 }
 0x132   : > { %v494_v60 = vpop.f32.mrb[0].mxu1 }
 0x133   : > { %v496_v61 = vpop.f32.mrb[1].mxu1 }
 0x136   : > { %v500_v63 = vpop.f32.mrb[2].mxu1 }
 0x137   : > { %v502_v1 = vpop.f32.mrb[3].mxu1 }
 0x13b   : > { %v858_v3 = vpop.f32.mrb[0].mxu0 }
 0x13c   : > { %v1198_v4 = vadd.f32 %v858_v3, %v494_v60  ;;  %v860_v5 = vpop.f32.mrb[1].mxu0 }
 0x13d   : > { %v1199_v6 = vadd.f32 %v860_v5, %v496_v61 }
 0x13e   : > { %v901_v7 = vadd.f32 %v1198_v4, %v894_v2 }
 0x13f   : > { %v864_v8 = vpop.f32.mrb[2].mxu0  ;;  %v902_v30 = vadd.f32 %v1199_v6, %v898_v21 }
 0x140   : > { %v1159_v9 = vmul.f32 -1.442695, %v901_v7  ;;  %v1200_v10 = vadd.f32 %v864_v8, %v500_v63  ;;  %v866_v11 = vpop.f32.mrb[3].mxu0 }
 0x141   : > { %v1201_v13 = vadd.f32 %v866_v11, %v502_v1 }
 0x142   : > { %1287 = vpow2.f32 %v1159_v9  ;;  %v903_v14 = vadd.f32 %v1200_v10, %v894_v2  ;;  %v622_v15 = vpop.f32.mrb[4].mxu1 }
 0x143   : > { %v870_v16 = vpop.f32.mrb[4].mxu0  ;;  %v624_v19 = vpop.f32.mrb[5].mxu1  ;;  %v904_v36 = vadd.f32 %v1201_v13, %v898_v21 }
 0x144   : > { %v1160_v17 = vmul.f32 -1.442695, %v903_v14  ;;  %v1202_v18 = vadd.f32 %v870_v16, %v622_v15  ;;  %v872_v20 = vpop.f32.mrb[5].mxu0 }
 0x145   : > { %v1203_v22 = vadd.f32 %v872_v20, %v624_v19 }
 0x146   : > { %1289 = vpow2.f32 %v1160_v17  ;;  %v905_v23 = vadd.f32 %v1202_v18, %v894_v2  ;;  %v628_v24 = vpop.f32.mrb[6].mxu1 }
 0x147   : > { %v876_v25 = vpop.f32.mrb[6].mxu0  ;;  %v630_v28 = vpop.f32.mrb[7].mxu1  ;;  %v906_v39 = vadd.f32 %v1203_v22, %v898_v21 }
 0x148   : > { %v1161_v26 = vmul.f32 -1.442695, %v905_v23  ;;  %v1204_v27 = vadd.f32 %v876_v25, %v628_v24  ;;  %v878_v29 = vpop.f32.mrb[7].mxu0 }
 0x149   : > { %v1205_v31 = vadd.f32 %v878_v29, %v630_v28 }
 0x14a   : > { %1291 = vpow2.f32 %v1161_v26  ;;  %v907_v32 = vadd.f32 %v1204_v27, %v894_v2 }
 0x14b   : > { %1293 = vtanh.f32 %v902_v30  ;;  %v908_v42 = vadd.f32 %v1205_v31, %v898_v21 }
 0x14c   : > { %v1288_v33 = vpop.eup %1287  ;;  %v1162_v34 = vmul.f32 -1.442695, %v907_v32 }
 0x14d   : > { %v921_v35 = vadd.f32 1.0, %v1288_v33 }
 0x14e   : > { %1295 = vpow2.f32 %v1162_v34 }
 0x14f   : > { %1297 = vrcp.f32 %v921_v35 }
 0x150   : > { %v1290_v37 = vpop.eup %1289  ;;  %1299 = vtanh.f32 %v904_v36 }
 0x151   : > { %v922_v38 = vadd.f32 1.0, %v1290_v37 }
 0x153   : > { %1301 = vrcp.f32 %v922_v38 }
 0x154   : > { %v1292_v40 = vpop.eup %1291  ;;  %1303 = vtanh.f32 %v906_v39 }
 0x155   : > { %v923_v41 = vadd.f32 1.0, %v1292_v40  ;;  %v1294_v43 = vpop.eup %1293 }
 0x157   : > { %1305 = vrcp.f32 %v923_v41 }
 0x158   : > { %v1296_v44 = vpop.eup %1295  ;;  %1307 = vtanh.f32 %v908_v42 }
 0x159   : > { %v1298_v45 = vpop.eup %1297  ;;  %v924_v46 = vadd.f32 1.0, %v1296_v44 }
 0x15a   : > { %v937_v47 = vmul.f32 %v1298_v45, %v1294_v43  ;;  %v1300_v48 = vpop.eup %1299 }
 0x15b   : > { %1309 = vrcp.f32 %v924_v46 }
 0x15c   : > { %941 = vst [vmem:[%s1502_s8] sm:$0xff] %v937_v47 }
 0x15d   : > { %v1302_v49 = vpop.eup %1301 }
 0x15e   : > { %v938_v50 = vmul.f32 %v1302_v49, %v1300_v48  ;;  %v1304_v51 = vpop.eup %1303 }
 0x160   : > { %942 = vst [vmem:[%s1502_s8 + $0x8] sm:$0xff] %v938_v50 }
 0x161   : > { %v1306_v52 = vpop.eup %1305 }
 0x162   : > { %v939_v53 = vmul.f32 %v1306_v52, %v1304_v51  ;;  %v1308_v54 = vpop.eup %1307  ;;  %947 = sbr.rel (%p1127_p7) target bundleno = 361 (0x169), region = 48 }
 0x164   : > { %943 = vst [vmem:[%s1502_s8 + $0x10] sm:$0xff] %v939_v53 }
 0x165   : > { %v1310_v55 = vpop.eup %1309 }
 0x166   : > { %v940_v56 = vmul.f32 %v1310_v55, %v1308_v54 }
 0x168   : > { %944 = vst [vmem:[%s1502_s8 + $0x18] sm:$0xff] %v940_v56 }
 0x169 PF: > { %v949_v58 = vadd.f32 %v938_v50, %v937_v47  ;;  %v958_v60 = vmul.f32 %v937_v47, %v937_v47  ;;  %v959_v61 = vmul.f32 %v938_v50, %v938_v50  ;;  %v960_v62 = vmul.f32 %v939_v53, %v939_v53  ;;  %v977_v17 = vld [vmem:[%s1494_s28] sm:$0xff] }
 0x16a   : > { %v961_v0 = vmul.f32 %v940_v56, %v940_v56  ;;  %vm974_vm6 = vcmp.eq.s32.totalorder %v1580_v59, 1  ;;  %vm973_vm7 = vcmp.eq.s32.totalorder %v1580_v59, 0 }
 0x16b   : > { %v950_v63 = vadd.f32 %v949_v58, %v939_v53  ;;  %v962_v1 = vadd.f32 %v959_v61, %v958_v60 }
 0x16d   : > { %v951_v2 = vadd.f32 %v950_v63, %v940_v56  ;;  %v963_v3 = vadd.f32 %v962_v1, %v960_v62 }
 0x16f   : > { %v952_v4 = vrot.slane %v951_v2, 4  ;;  %v964_v5 = vadd.f32 %v963_v3, %v961_v0 }
 0x171   : > { %v953_v6 = vadd.f32 %v952_v4, %v951_v2  ;;  %v965_v7 = vrot.slane %v964_v5, 4 }
 0x173   : > { %v954_v8 = vrot.slane %v953_v6, 2  ;;  %v966_v9 = vadd.f32 %v965_v7, %v964_v5 }
 0x175   : > { %v955_v10 = vadd.f32 %v954_v8, %v953_v6  ;;  %v967_v11 = vrot.slane %v966_v9, 2 }
 0x177   : > { %v956_v12 = vrot.slane %v955_v10, 1  ;;  %v968_v13 = vadd.f32 %v967_v11, %v966_v9 }
 0x179   : > { %v969_v14 = vrot.slane %v968_v13, 1  ;;  %v957_v15 = vadd.f32 %v956_v12, %v955_v10 }
 0x17b   : > { %v970_v16 = vadd.f32 %v969_v14, %v968_v13 }
 0x17d   : > { %v975_v18 = vsel %vm974_vm6, %v970_v16, 0.0 }
 0x17e   : > { %v976_v19 = vsel %vm973_vm7, %v957_v15, %v975_v18 }
 0x17f   : > { %v978_v20 = vadd.f32 %v977_v17, %v976_v19 }
 0x181   : > { %979 = vst [vmem:[%s1494_s28] sm:$0xff] %v978_v20 }
 0x182 PF: > { %s16_s19 = sadd.s32 1, %s1381_s19   ;;  %s1628_s15 = smov %s1373_s17 }
 0x183   : > { %p13_p11 = scmp.ge.s32.totalorder %s16_s19, 18   ;;  %s1629_s16 = smov %s1377_s18 }
 0x184   : > { %s1630_s17 = smov %s1633_s21  ;;  %s1631_s18 = smov %s1637_s22 }
 0x185   :  { %15 = sbr.rel (!%p13_p11) target bundleno = 3 (0x3), region = 95 }
 0x18c   :  { %1024 = vsyncpa [#allocation4], 1 }
 0x18d   :  { %1026 = vsyncpa [#allocation4 + $0x1], 1 }

// kernel: _lambda_.4
= control target key start
LH: loop header
LB: loop body
LE: loop exit
PB: predicated region body
PF: predicated region fallthrough
CT: control target
= control target key end

     0   :  { %s1712_s21 = smov 0   ;;  %s1714_s22 = smov 0   ;;  %s2320_s0 = inlined_call_operand.vmem [shape: f32[4,128,128], index: 0, kind: input, shape index: {}]   ;;  %s2321_s1 = inlined_call_operand.vmem [shape: f32[1,128], index: 1, kind: input, shape index: {}]   ;;  %s2322_s2 = inlined_call_operand.vmem [shape: f32[1,128], index: 2, kind: input, shape index: {}]   ;;  %s2323_s3 = inlined_call_operand.vmem [shape: f32[5,128,256], index: 3, kind: input, shape index: {}]   ;;  %s2324_s4 = inlined_call_operand.vmem [shape: f32[1,256], index: 4, kind: input, shape index: {}]   ;;  %s2325_s5 = inlined_call_operand.vmem [shape: f32[4,128,128], index: 5, kind: output, shape index: {0}]   ;;  %s2326_s6 = inlined_call_operand.vmem [shape: f32[4,8,128], index: 6, kind: output, shape index: {1}]  }
   0x1   :  { %s1716_s23 = smov 0   ;;  %s1718_s24 = smov 0  }
   0x2   :  { %s1720_s25 = smov 0  }
   0x3 LB: > { %s26_s26 = sadd.s32 1, %s1664_s23  ;;  %s29_s27 = sadd.s32 1, %s1668_s24  ;;  %s1672_s25 = sphi %s1720_s25, %s17_s25   ;;  %s1668_s24 = sphi %s1718_s24, %s2330_s24   ;;  %s1664_s23 = sphi %s1716_s23, %s2329_s23   ;;  %s1660_s22 = sphi %s1714_s22, %s2328_s22   ;;  %s1656_s21 = sphi %s1712_s21, %s2327_s21  }
   0x4   : > { %p27_p0 = scmp.ge.s32.totalorder %s26_s26, 4  ;;  %p1212_p1 = scmp.ge.s32.totalorder %s1672_s25, 1 }
   0x5   : > { %p236_p2 = scmp.lt.s32.totalorder %s1672_s25, 17 }
   0x6   : > { %s2332_s26 = smov (%p27_p0, %s26_s26), 0  ;;  %s2334_s27 = smov (!%p27_p0, %s29_s27), %s1668_s24 }
   0x7   : > { %p237_p3 = pnand %p1212_p1, %p236_p2  ;;  %p31_p4 = scmp.ge.s32.totalorder %s2334_s27, 4 }
   0x8   : > { %s1213_s28 = sshll.u32 (!%p237_p3), %s1656_s21, 2  ;;  %p279_p5 = scmp.lt.s32.totalorder (!%p237_p3), %s1660_s22, 3  ;;  %v1220_v0 = vld [vmem:[%s2321_s1] ss:$0 sm:$0xff] (!%p237_p3) }
   0x9   : > { %s2336_s27 = smov (%p31_p4, %s2334_s27), 0  ;;  %240 = sbr.rel (%p237_p3) target bundleno = 410 (0x19a), region = 40 }
   0xa   : > { %p281_p6 = scmp.lt.s32.totalorder (!%p237_p3), %s1213_s28, 15  ;;  %v1221_v1 = vld [vmem:[%s2322_s2] ss:$0 sm:$0xff] (!%p237_p3)  ;;  %p1222_p7 = scmp.ne.s32.totalorder (!%p237_p3), %s1656_s21, 0 }
  0x10   : > { %s2338_s22 = smov (!%p279_p5, %s1660_s22), 3  ;;  %s2340_s28 = smov (!%p281_p6, %s1213_s28), 15 }
  0x11   : > { %s1214_s29 = sshll.u32 %s2338_s22, 4  ;;  %s1219_s30 = sshll.u32 %s2338_s22, 3  ;;  %v1674_v14 = vmov (!%p1222_p7), 0.0  }
  0x12   : > { %s284_s7 = sadd.s32 %s1214_s29, %s2340_s28  ;;  %s1748_s10 = scalar_lea.vmem %s2326_s6, %s1219_s30  ;;  %332 = vst [vmem:[#allocation2] sm:$0xff] (!%p1222_p7), %v1674_v14 }
  0x13   : > { %s1215_s11 = sshll.u32 %s284_s7, 3  ;;  %331 = sbr.rel (%p1222_p7) target bundleno = 26 (0x1a), region = 44 }
  0x14   : > { %s286_s16 = scalar_lea.vmem %s2320_s0, %s1215_s11  ;;  %s1759_s19 = scalar_lea.vmem %s2325_s5, %s1215_s11 }
  0x15   : > { %v302_v2 = vld [vmem:[%s286_s16] sm:$0xff]  ;;  %v303_v3 = vld [vmem:[%s286_s16 + $0x8] sm:$0xff]  ;;  %v304_v4 = vld [vmem:[%s286_s16 + $0x10] sm:$0xff] }
  0x16   : > { %v305_v5 = vld [vmem:[%s286_s16 + $0x18] sm:$0xff]  ;;  %v313_v6 = vmul.f32 %v1220_v0, %v302_v2  ;;  %v314_v7 = vmul.f32 %v1220_v0, %v303_v3  ;;  %v315_v8 = vmul.f32 %v1220_v0, %v304_v4 }
  0x17   : > { %v316_v9 = vmul.f32 %v1220_v0, %v305_v5 }
  0x18   : > { %v1764_v10 = vadd.f32 %v1221_v1, %v313_v6  ;;  %v1766_v11 = vadd.f32 %v1221_v1, %v314_v7  ;;  %v1768_v12 = vadd.f32 %v1221_v1, %v315_v8 }
  0x19   : > { %v1770_v13 = vadd.f32 %v1221_v1, %v316_v9 }
  0x1a PF: > { %p1223_p8 = scmp.le.s32.totalorder %s1656_s21, 0 }
  0x1b   : > { %v337_v15 = vld [vmem:[#allocation2 + $0x20] sm:$0xff] (!%p1223_p8) }
  0x1c   : > { %336 = sbr.rel (%p1223_p8) target bundleno = 35 (0x23), region = 48  ;;  %338 = vst [vmem:[#allocation2] sm:$0xff] (!%p1223_p8), %v337_v15 }
  0x23 PF: > { %v1225_v16 = vld [vmem:[%s2323_s3 + $0x108] sm:$0xff]  ;;  %v1227_v17 = vld [vmem:[%s2323_s3 + $0x118] sm:$0xff]  ;;  %339 = vst [vmem:[#allocation2 + $0x8] sm:$0xff] %v1764_v10  ;;  %340 = vst [vmem:[#allocation2 + $0x10] sm:$0xff] %v1766_v11  ;;  %v1675_v23 = vmov 0.0  }
  0x24   : > { %v1257_v18 = vld [vmem:[%s2323_s3 + $0x208] sm:$0xff]  ;;  %341 = vst [vmem:[#allocation2 + $0x18] sm:$0xff] %v1768_v12  ;;  %342 = vst [vmem:[#allocation2 + $0x20] sm:$0xff] %v1770_v13  ;;  %v1359_v19 = vpack.c.bf16 %v1227_v17, %v1225_v16  ;;  %v1259_v20 = vld [vmem:[%s2323_s3 + $0x218] sm:$0xff]  ;;  %480 = vmatprep.mubr.f32.mxu1 %v1675_v23  ;;  %695 = vmatprep.mubr.f32.mxu0 %v1675_v23 }
  0x25   : > { %v1224_v21 = vld [vmem:[%s2323_s3 + $0x100] sm:$0xff]  ;;  %v1226_v22 = vld [vmem:[%s2323_s3 + $0x110] sm:$0xff]  ;;  %v1423_v24 = vpack.c.bf16 %v1259_v20, %v1257_v18  ;;  %v1229_v28 = vld [vmem:[%s2323_s3 + $0x128] sm:$0xff] }
  0x26   : > { %v1361_v25 = vpack.c.bf16 %v1226_v22, %v1224_v21  ;;  %v1256_v26 = vld [vmem:[%s2323_s3 + $0x200] sm:$0xff]  ;;  %v1258_v27 = vld [vmem:[%s2323_s3 + $0x210] sm:$0xff]  ;;  %1360 = vmatprep.subr.bf16.mxu1 %v1359_v19  ;;  %v1231_v30 = vld [vmem:[%s2323_s3 + $0x138] sm:$0xff] }
  0x27   : > { %v1425_v29 = vpack.c.bf16 %v1258_v27, %v1256_v26  ;;  %v1261_v31 = vld [vmem:[%s2323_s3 + $0x228] sm:$0xff]  ;;  %v1263_v32 = vld [vmem:[%s2323_s3 + $0x238] sm:$0xff]  ;;  %1424 = vmatprep.subr.bf16.mxu0 %v1423_v24  ;;  %v1363_v33 = vpack.c.bf16 %v1231_v30, %v1229_v28  ;;  %v1228_v35 = vld [vmem:[%s2323_s3 + $0x120] sm:$0xff] }
  0x28   : > { %1362 = vmatpush1.bf16.msra.mxu1 %v1361_v25  ;;  %v1427_v34 = vpack.c.bf16 %v1263_v32, %v1261_v31  ;;  %v1230_v36 = vld [vmem:[%s2323_s3 + $0x130] sm:$0xff]  ;;  %v1260_v37 = vld [vmem:[%s2323_s3 + $0x220] sm:$0xff]  ;;  %v1233_v40 = vld [vmem:[%s2323_s3 + $0x148] sm:$0xff] }
  0x29   : > { %1426 = vmatpush1.bf16.msra.mxu0 %v1425_v29  ;;  %v1365_v38 = vpack.c.bf16 %v1230_v36, %v1228_v35  ;;  %v1262_v39 = vld [vmem:[%s2323_s3 + $0x230] sm:$0xff]  ;;  %v1235_v41 = vld [vmem:[%s2323_s3 + $0x158] sm:$0xff]  ;;  %1364 = vmatprep.subr.bf16.mxu1 %v1363_v33  ;;  %v1265_v44 = vld [vmem:[%s2323_s3 + $0x248] sm:$0xff] }
  0x2a   : > { %1428 = vmatprep.subr.bf16.mxu0 %v1427_v34  ;;  %v1429_v42 = vpack.c.bf16 %v1262_v39, %v1260_v37  ;;  %v1367_v43 = vpack.c.bf16 %v1235_v41, %v1233_v40  ;;  %v1267_v45 = vld [vmem:[%s2323_s3 + $0x258] sm:$0xff]  ;;  %v1232_v46 = vld [vmem:[%s2323_s3 + $0x140] sm:$0xff]  ;;  %v1234_v48 = vld [vmem:[%s2323_s3 + $0x150] sm:$0xff] }
  0x2b   : > { %v1431_v47 = vpack.c.bf16 %v1267_v45, %v1265_v44  ;;  %v1264_v49 = vld [vmem:[%s2323_s3 + $0x240] sm:$0xff]  ;;  %v1266_v50 = vld [vmem:[%s2323_s3 + $0x250] sm:$0xff]  ;;  %v1369_v51 = vpack.c.bf16 %v1234_v48, %v1232_v46  ;;  %v1237_v52 = vld [vmem:[%s2323_s3 + $0x168] sm:$0xff] }
  0x2c   : > { %1366 = vmatpush1.bf16.msra.mxu1 %v1365_v38  ;;  %v1239_v53 = vld [vmem:[%s2323_s3 + $0x178] sm:$0xff]  ;;  %v1269_v54 = vld [vmem:[%s2323_s3 + $0x268] sm:$0xff]  ;;  %v1433_v55 = vpack.c.bf16 %v1266_v50, %v1264_v49  ;;  %v1236_v58 = vld [vmem:[%s2323_s3 + $0x160] sm:$0xff] }
  0x2d   : > { %1430 = vmatpush1.bf16.msra.mxu0 %v1429_v42  ;;  %1368 = vmatprep.subr.bf16.mxu1 %v1367_v43  ;;  %v1371_v56 = vpack.c.bf16 %v1239_v53, %v1237_v52  ;;  %v1271_v57 = vld [vmem:[%s2323_s3 + $0x278] sm:$0xff]  ;;  %v1238_v59 = vld [vmem:[%s2323_s3 + $0x170] sm:$0xff]  ;;  %v1268_v61 = vld [vmem:[%s2323_s3 + $0x260] sm:$0xff] }
  0x2e   : > { %1432 = vmatprep.subr.bf16.mxu0 %v1431_v47  ;;  %v1435_v60 = vpack.c.bf16 %v1271_v57, %v1269_v54  ;;  %v1270_v62 = vld [vmem:[%s2323_s3 + $0x270] sm:$0xff]  ;;  %v1241_v63 = vld [vmem:[%s2323_s3 + $0x188] sm:$0xff]  ;;  %v1243_v0 = vld [vmem:[%s2323_s3 + $0x198] sm:$0xff]  ;;  %v1373_v3 = vpack.c.bf16 %v1238_v59, %v1236_v58 }
  0x2f   : > { %v1273_v1 = vld [vmem:[%s2323_s3 + $0x288] sm:$0xff]  ;;  %v1275_v2 = vld [vmem:[%s2323_s3 + $0x298] sm:$0xff]  ;;  %v1437_v4 = vpack.c.bf16 %v1270_v62, %v1268_v61  ;;  %v1375_v5 = vpack.c.bf16 %v1243_v0, %v1241_v63  ;;  %v1240_v6 = vld [vmem:[%s2323_s3 + $0x180] sm:$0xff] }
  0x30   : > { %1370 = vmatpush1.bf16.msra.mxu1 %v1369_v51  ;;  %v1242_v7 = vld [vmem:[%s2323_s3 + $0x190] sm:$0xff]  ;;  %v1272_v8 = vld [vmem:[%s2323_s3 + $0x280] sm:$0xff]  ;;  %v1439_v9 = vpack.c.bf16 %v1275_v2, %v1273_v1  ;;  %v1245_v15 = vld [vmem:[%s2323_s3 + $0x1a8] sm:$0xff] }
  0x31   : > { %1434 = vmatpush1.bf16.msra.mxu0 %v1433_v55  ;;  %1372 = vmatprep.subr.bf16.mxu1 %v1371_v56  ;;  %v1274_v14 = vld [vmem:[%s2323_s3 + $0x290] sm:$0xff]  ;;  %v1247_v16 = vld [vmem:[%s2323_s3 + $0x1b8] sm:$0xff]  ;;  %v1277_v17 = vld [vmem:[%s2323_s3 + $0x2a8] sm:$0xff]  ;;  %v1377_v19 = vpack.c.bf16 %v1242_v7, %v1240_v6 }
  0x32   : > { %1436 = vmatprep.subr.bf16.mxu0 %v1435_v60  ;;  %v1279_v18 = vld [vmem:[%s2323_s3 + $0x2b8] sm:$0xff]  ;;  %v1441_v20 = vpack.c.bf16 %v1274_v14, %v1272_v8  ;;  %v1379_v21 = vpack.c.bf16 %v1247_v16, %v1245_v15  ;;  %v1244_v22 = vld [vmem:[%s2323_s3 + $0x1a0] sm:$0xff]  ;;  %v1246_v24 = vld [vmem:[%s2323_s3 + $0x1b0] sm:$0xff] }
  0x33   : > { %v1276_v25 = vld [vmem:[%s2323_s3 + $0x2a0] sm:$0xff]  ;;  %v1443_v26 = vpack.c.bf16 %v1279_v18, %v1277_v17  ;;  %v1278_v27 = vld [vmem:[%s2323_s3 + $0x2b0] sm:$0xff]  ;;  %v1249_v28 = vld [vmem:[%s2323_s3 + $0x1c8] sm:$0xff]  ;;  %v1381_v32 = vpack.c.bf16 %v1246_v24, %v1244_v22 }
  0x34   : > { %1374 = vmatpush1.bf16.msra.mxu1 %v1373_v3  ;;  %v1251_v29 = vld [vmem:[%s2323_s3 + $0x1d8] sm:$0xff]  ;;  %v1281_v30 = vld [vmem:[%s2323_s3 + $0x2c8] sm:$0xff]  ;;  %v1445_v33 = vpack.c.bf16 %v1278_v27, %v1276_v25  ;;  %v1248_v35 = vld [vmem:[%s2323_s3 + $0x1c0] sm:$0xff] }
  0x35   : > { %1438 = vmatpush1.bf16.msra.mxu0 %v1437_v4  ;;  %1376 = vmatprep.subr.bf16.mxu1 %v1375_v5  ;;  %v1283_v31 = vld [vmem:[%s2323_s3 + $0x2d8] sm:$0xff]  ;;  %v1383_v34 = vpack.c.bf16 %v1251_v29, %v1249_v28  ;;  %v1250_v36 = vld [vmem:[%s2323_s3 + $0x1d0] sm:$0xff]  ;;  %v1280_v37 = vld [vmem:[%s2323_s3 + $0x2c0] sm:$0xff] }
  0x36   : > { %1440 = vmatprep.subr.bf16.mxu0 %v1439_v9  ;;  %v1447_v38 = vpack.c.bf16 %v1283_v31, %v1281_v30  ;;  %v1282_v39 = vld [vmem:[%s2323_s3 + $0x2d0] sm:$0xff]  ;;  %v1253_v40 = vld [vmem:[%s2323_s3 + $0x1e8] sm:$0xff]  ;;  %v1255_v41 = vld [vmem:[%s2323_s3 + $0x1f8] sm:$0xff]  ;;  %v1385_v44 = vpack.c.bf16 %v1250_v36, %v1248_v35 }
  0x37   : > { %v1285_v42 = vld [vmem:[%s2323_s3 + $0x2e8] sm:$0xff]  ;;  %v1287_v43 = vld [vmem:[%s2323_s3 + $0x2f8] sm:$0xff]  ;;  %v1449_v45 = vpack.c.bf16 %v1282_v39, %v1280_v37  ;;  %v1387_v46 = vpack.c.bf16 %v1255_v41, %v1253_v40  ;;  %v1252_v47 = vld [vmem:[%s2323_s3 + $0x1e0] sm:$0xff] }
  0x38   : > { %1378 = vmatpush1.bf16.msra.mxu1 %v1377_v19  ;;  %v1254_v48 = vld [vmem:[%s2323_s3 + $0x1f0] sm:$0xff]  ;;  %v1284_v49 = vld [vmem:[%s2323_s3 + $0x2e0] sm:$0xff]  ;;  %v1451_v50 = vpack.c.bf16 %v1287_v43, %v1285_v42  ;;  %v348_v52 = vld [vmem:[%s2323_s3 + $0x8] sm:$0xff] }
  0x39   : > { %1442 = vmatpush1.bf16.msra.mxu0 %v1441_v20  ;;  %1380 = vmatprep.subr.bf16.mxu1 %v1379_v21  ;;  %v1286_v51 = vld [vmem:[%s2323_s3 + $0x2f0] sm:$0xff]  ;;  %v350_v53 = vld [vmem:[%s2323_s3 + $0x18] sm:$0xff]  ;;  %v1289_v54 = vld [vmem:[%s2323_s3 + $0x308] sm:$0xff]  ;;  %v1389_v56 = vpack.c.bf16 %v1254_v48, %v1252_v47 }
  0x3a   : > { %1444 = vmatprep.subr.bf16.mxu0 %v1443_v26  ;;  %v1291_v55 = vld [vmem:[%s2323_s3 + $0x318] sm:$0xff]  ;;  %v1453_v57 = vpack.c.bf16 %v1286_v51, %v1284_v49  ;;  %v1391_v58 = vpack.c.bf16 %v350_v53, %v348_v52  ;;  %v347_v59 = vld [vmem:[%s2323_s3] sm:$0xff]  ;;  %v349_v60 = vld [vmem:[%s2323_s3 + $0x10] sm:$0xff] }
  0x3b   : > { %v1288_v61 = vld [vmem:[%s2323_s3 + $0x300] sm:$0xff]  ;;  %v1455_v62 = vpack.c.bf16 %v1291_v55, %v1289_v54  ;;  %v1290_v63 = vld [vmem:[%s2323_s3 + $0x310] sm:$0xff]  ;;  %v352_v0 = vld [vmem:[%s2323_s3 + $0x28] sm:$0xff]  ;;  %v1393_v5 = vpack.c.bf16 %v349_v60, %v347_v59 }
  0x3c   : > { %1382 = vmatpush1.bf16.msra.mxu1 %v1381_v32  ;;  %v354_v1 = vld [vmem:[%s2323_s3 + $0x38] sm:$0xff]  ;;  %v1293_v2 = vld [vmem:[%s2323_s3 + $0x328] sm:$0xff]  ;;  %v1457_v7 = vpack.c.bf16 %v1290_v63, %v1288_v61  ;;  %v351_v9 = vld [vmem:[%s2323_s3 + $0x20] sm:$0xff] }
  0x3d   : > { %1446 = vmatpush1.bf16.msra.mxu0 %v1445_v33  ;;  %1384 = vmatprep.subr.bf16.mxu1 %v1383_v34  ;;  %v1295_v3 = vld [vmem:[%s2323_s3 + $0x338] sm:$0xff]  ;;  %v379_v4 = vld [vmem:[#allocation2 + $0x2] sm:$0xff]  ;;  %v1395_v8 = vpack.c.bf16 %v354_v1, %v352_v0  ;;  %v353_v14 = vld [vmem:[%s2323_s3 + $0x30] sm:$0xff] }
  0x3e   : > { %1448 = vmatprep.subr.bf16.mxu0 %v1447_v38  ;;  %v594_v6 = vld [vmem:[#allocation2 + $0x4] sm:$0xff]  ;;  %v1459_v16 = vpack.c.bf16 %v1295_v3, %v1293_v2  ;;  %v1294_v17 = vld [vmem:[%s2323_s3 + $0x330] sm:$0xff]  ;;  %v358_v19 = vld [vmem:[%s2323_s3 + $0x58] sm:$0xff]  ;;  %v1397_v22 = vpack.c.bf16 %v353_v14, %v351_v9 }
  0x3f   : > { %v1292_v15 = vld [vmem:[%s2323_s3 + $0x320] sm:$0xff]  ;;  %v356_v18 = vld [vmem:[%s2323_s3 + $0x48] sm:$0xff]  ;;  %v1299_v21 = vld [vmem:[%s2323_s3 + $0x358] sm:$0xff] }
  0x40   : > { %1386 = vmatpush1.bf16.msra.mxu1 %v1385_v44  ;;  %v1297_v20 = vld [vmem:[%s2323_s3 + $0x348] sm:$0xff]  ;;  %v355_v24 = vld [vmem:[%s2323_s3 + $0x40] sm:$0xff]  ;;  %v1461_v26 = vpack.c.bf16 %v1294_v17, %v1292_v15  ;;  %v1399_v27 = vpack.c.bf16 %v358_v19, %v356_v18  ;;  %v357_v28 = vld [vmem:[%s2323_s3 + $0x50] sm:$0xff] }
  0x41   : > { %1450 = vmatpush1.bf16.msra.mxu0 %v1449_v45  ;;  %1388 = vmatprep.subr.bf16.mxu1 %v1387_v46  ;;  %v380_v25 = vld [vmem:[#allocation2 + $0xa] sm:$0xff]  ;;  %v1296_v29 = vld [vmem:[%s2323_s3 + $0x340] sm:$0xff]  ;;  %v1463_v31 = vpack.c.bf16 %v1299_v21, %v1297_v20  ;;  %v362_v34 = vld [vmem:[%s2323_s3 + $0x78] sm:$0xff]  ;;  %v1401_v37 = vpack.c.bf16 %v357_v28, %v355_v24 }
  0x42   : > { %1452 = vmatprep.subr.bf16.mxu0 %v1451_v50  ;;  %v595_v30 = vld [vmem:[#allocation2 + $0xc] sm:$0xff]  ;;  %v1303_v36 = vld [vmem:[%s2323_s3 + $0x378] sm:$0xff]  ;;  %v359_v38 = vld [vmem:[%s2323_s3 + $0x60] sm:$0xff] }
  0x43   : > { %v1298_v32 = vld [vmem:[%s2323_s3 + $0x350] sm:$0xff]  ;;  %v360_v33 = vld [vmem:[%s2323_s3 + $0x68] sm:$0xff]  ;;  %v1300_v43 = vld [vmem:[%s2323_s3 + $0x360] sm:$0xff] }
  0x44   : > { %1390 = vmatpush1.bf16.msra.mxu1 %v1389_v56  ;;  %v1301_v35 = vld [vmem:[%s2323_s3 + $0x368] sm:$0xff]  ;;  %v381_v39 = vld [vmem:[#allocation2 + $0x12] sm:$0xff]  ;;  %v1465_v40 = vpack.c.bf16 %v1298_v32, %v1296_v29  ;;  %v1403_v41 = vpack.c.bf16 %v362_v34, %v360_v33  ;;  %v363_v52 = vld [vmem:[%s2323_s3 + $0x80] sm:$0xff] }
  0x45   : > { %1454 = vmatpush1.bf16.msra.mxu0 %v1453_v57  ;;  %1392 = vmatprep.subr.bf16.mxu1 %v1391_v58  ;;  %v361_v42 = vld [vmem:[%s2323_s3 + $0x70] sm:$0xff]  ;;  %v1467_v45 = vpack.c.bf16 %v1303_v36, %v1301_v35  ;;  %v364_v47 = vld [vmem:[%s2323_s3 + $0x88] sm:$0xff]  ;;  %v366_v48 = vld [vmem:[%s2323_s3 + $0x98] sm:$0xff] }
  0x46   : > { %1456 = vmatprep.subr.bf16.mxu0 %v1455_v62  ;;  %v596_v44 = vld [vmem:[#allocation2 + $0x14] sm:$0xff]  ;;  %v1305_v49 = vld [vmem:[%s2323_s3 + $0x388] sm:$0xff]  ;;  %v1405_v51 = vpack.c.bf16 %v361_v42, %v359_v38  ;;  %v1407_v55 = vpack.c.bf16 %v366_v48, %v364_v47  ;;  %v1304_v57 = vld [vmem:[%s2323_s3 + $0x380] sm:$0xff] }
  0x47   : > { %481 = vmatmul.mubr.f32.vlgmr.msra.gmra.mrb[0].mxu1 %v379_v4  ;;  %v1302_v46 = vld [vmem:[%s2323_s3 + $0x370] sm:$0xff]  ;;  %v1307_v50 = vld [vmem:[%s2323_s3 + $0x398] sm:$0xff]  ;;  %v368_v61 = vld [vmem:[%s2323_s3 + $0xa8] sm:$0xff] }
  0x48   : > { %1394 = vmatpush1.bf16.msra.mxu1 %v1393_v5  ;;  %696 = vmatmul.mubr.f32.vlgmr.msra.gmra.mrb[0].mxu0 %v594_v6  ;;  %v382_v53 = vld [vmem:[#allocation2 + $0x1a] sm:$0xff]  ;;  %v1469_v54 = vpack.c.bf16 %v1302_v46, %v1300_v43  ;;  %v365_v56 = vld [vmem:[%s2323_s3 + $0x90] sm:$0xff]  ;;  %v1471_v59 = vpack.c.bf16 %v1307_v50, %v1305_v49  ;;  %v1309_v63 = vld [vmem:[%s2323_s3 + $0x3a8] sm:$0xff] }
  0x49   : > { %1458 = vmatpush1.bf16.msra.mxu0 %v1457_v7  ;;  %1396 = vmatprep.subr.bf16.mxu1 %v1395_v8  ;;  %v597_v58 = vld [vmem:[#allocation2 + $0x1c] sm:$0xff]  ;;  %v1306_v60 = vld [vmem:[%s2323_s3 + $0x390] sm:$0xff]  ;;  %v1409_v1 = vpack.c.bf16 %v365_v56, %v363_v52  ;;  %v372_v9 = vld [vmem:[%s2323_s3 + $0xc8] sm:$0xff] }
  0x4a   : > { %1460 = vmatprep.subr.bf16.mxu0 %v1459_v16  ;;  %486 = vmatprep.mubr.f32.mxu1 %v1675_v23  ;;  %v370_v62 = vld [vmem:[%s2323_s3 + $0xb8] sm:$0xff]  ;;  %v1473_v2 = vpack.c.bf16 %v1306_v60, %v1304_v57  ;;  %v367_v4 = vld [vmem:[%s2323_s3 + $0xa0] sm:$0xff]  ;;  %v369_v5 = vld [vmem:[%s2323_s3 + $0xb0] sm:$0xff] }
  0x4b   : > { %701 = vmatprep.mubr.f32.mxu0 %v1675_v23  ;;  %487 = vmatmul.mubr.f32.gmra.mrb[2].mxu1 %v380_v25  ;;  %v1311_v0 = vld [vmem:[%s2323_s3 + $0x3b8] sm:$0xff]  ;;  %v1411_v3 = vpack.c.bf16 %v370_v62, %v368_v61  ;;  %v1308_v6 = vld [vmem:[%s2323_s3 + $0x3a0] sm:$0xff]  ;;  %v1310_v8 = vld [vmem:[%s2323_s3 + $0x3b0] sm:$0xff]  ;;  %v1413_v17 = vpack.c.bf16 %v369_v5, %v367_v4 }
  0x4c   : > { %1398 = vmatpush1.bf16.msra.mxu1 %v1397_v22  ;;  %702 = vmatmul.mubr.f32.gmra.mrb[2].mxu0 %v595_v30  ;;  %v1475_v7 = vpack.c.bf16 %v1311_v0, %v1309_v63  ;;  %v374_v14 = vld [vmem:[%s2323_s3 + $0xd8] sm:$0xff]  ;;  %v1313_v15 = vld [vmem:[%s2323_s3 + $0x3c8] sm:$0xff]  ;;  %v1477_v18 = vpack.c.bf16 %v1310_v8, %v1308_v6  ;;  %v371_v20 = vld [vmem:[%s2323_s3 + $0xc0] sm:$0xff] }
  0x4d   : > { %1462 = vmatpush1.bf16.msra.mxu0 %v1461_v26  ;;  %1400 = vmatprep.subr.bf16.mxu1 %v1399_v27  ;;  %v1315_v16 = vld [vmem:[%s2323_s3 + $0x3d8] sm:$0xff]  ;;  %v1415_v19 = vpack.c.bf16 %v374_v14, %v372_v9  ;;  %v373_v21 = vld [vmem:[%s2323_s3 + $0xd0] sm:$0xff]  ;;  %v1312_v22 = vld [vmem:[%s2323_s3 + $0x3c0] sm:$0xff] }
  0x4e   : > { %1464 = vmatprep.subr.bf16.mxu0 %v1463_v31  ;;  %492 = vmatprep.mubr.f32.mxu1 %v1675_v23  ;;  %v1479_v24 = vpack.c.bf16 %v1315_v16, %v1313_v15  ;;  %v1314_v25 = vld [vmem:[%s2323_s3 + $0x3d0] sm:$0xff]  ;;  %v376_v26 = vld [vmem:[%s2323_s3 + $0xe8] sm:$0xff]  ;;  %v378_v27 = vld [vmem:[%s2323_s3 + $0xf8] sm:$0xff]  ;;  %v1417_v30 = vpack.c.bf16 %v373_v21, %v371_v20 }
  0x4f   : > { %707 = vmatprep.mubr.f32.mxu0 %v1675_v23  ;;  %493 = vmatmul.mubr.f32.gmra.mrb[4].mxu1 %v381_v39  ;;  %v1317_v28 = vld [vmem:[%s2323_s3 + $0x3e8] sm:$0xff]  ;;  %v1319_v29 = vld [vmem:[%s2323_s3 + $0x3f8] sm:$0xff]  ;;  %v1481_v31 = vpack.c.bf16 %v1314_v25, %v1312_v22  ;;  %v1419_v32 = vpack.c.bf16 %v378_v27, %v376_v26  ;;  %v375_v33 = vld [vmem:[%s2323_s3 + $0xe0] sm:$0xff] }
  0x50   : > { %1402 = vmatpush1.bf16.msra.mxu1 %v1401_v37  ;;  %708 = vmatmul.mubr.f32.gmra.mrb[4].mxu0 %v596_v44  ;;  %v377_v34 = vld [vmem:[%s2323_s3 + $0xf0] sm:$0xff]  ;;  %v1316_v35 = vld [vmem:[%s2323_s3 + $0x3e0] sm:$0xff]  ;;  %v1483_v36 = vpack.c.bf16 %v1319_v29, %v1317_v28  ;;  %v1321_v38 = vld [vmem:[%s2323_s3 + $0x408] sm:$0xff] }
  0x51   : > { %1466 = vmatpush1.bf16.msra.mxu0 %v1465_v40  ;;  %1404 = vmatprep.subr.bf16.mxu1 %v1403_v41  ;;  %v1318_v37 = vld [vmem:[%s2323_s3 + $0x3f0] sm:$0xff]  ;;  %v1323_v39 = vld [vmem:[%s2323_s3 + $0x418] sm:$0xff]  ;;  %v1421_v40 = vpack.c.bf16 %v377_v34, %v375_v33  ;;  %v1320_v43 = vld [vmem:[%s2323_s3 + $0x400] sm:$0xff] }
  0x52   : > { %1468 = vmatprep.subr.bf16.mxu0 %v1467_v45  ;;  %498 = vmatprep.mubr.f32.mxu1 %v1675_v23  ;;  %v1485_v41 = vpack.c.bf16 %v1318_v37, %v1316_v35  ;;  %v1487_v42 = vpack.c.bf16 %v1323_v39, %v1321_v38  ;;  %v1322_v44 = vld [vmem:[%s2323_s3 + $0x410] sm:$0xff]  ;;  %v1325_v45 = vld [vmem:[%s2323_s3 + $0x428] sm:$0xff]  ;;  %v1327_v46 = vld [vmem:[%s2323_s3 + $0x438] sm:$0xff] }
  0x53   : > { %713 = vmatprep.mubr.f32.mxu0 %v1675_v23  ;;  %499 = vmatmul.mubr.f32.gmra.mrb[6].mxu1 %v382_v53  ;;  %v343_v47 = vld [vmem:[#allocation2] sm:$0xff]  ;;  %v1489_v48 = vpack.c.bf16 %v1322_v44, %v1320_v43  ;;  %v1491_v52 = vpack.c.bf16 %v1327_v46, %v1325_v45  ;;  %v1329_v53 = vld [vmem:[%s2323_s3 + $0x448] sm:$0xff]  ;;  %v1335_v61 = vld [vmem:[%s2323_s3 + $0x478] sm:$0xff] }
  0x54   : > { %1406 = vmatpush1.bf16.msra.mxu1 %v1405_v51  ;;  %714 = vmatmul.mubr.f32.gmra.mrb[6].mxu0 %v597_v58  ;;  %v728_v49 = vld [vmem:[#allocation2 + $0x6] sm:$0xff]  ;;  %v1326_v51 = vld [vmem:[%s2323_s3 + $0x430] sm:$0xff]  ;;  %v1339_v4 = vld [vmem:[%s2323_s3 + $0x498] sm:$0xff] }
  0x55   : > { %1470 = vmatpush1.bf16.msra.mxu0 %v1469_v54  ;;  %1408 = vmatprep.subr.bf16.mxu1 %v1407_v55  ;;  %v1324_v50 = vld [vmem:[%s2323_s3 + $0x420] sm:$0xff]  ;;  %v1331_v54 = vld [vmem:[%s2323_s3 + $0x458] sm:$0xff]  ;;  %v729_v56 = vld [vmem:[#allocation2 + $0xe] sm:$0xff] }
  0x56   : > { %1472 = vmatprep.subr.bf16.mxu0 %v1471_v59  ;;  %569 = vmatprep.mubr.f32.mxu1 %v1675_v23  ;;  %v1493_v55 = vpack.c.bf16 %v1326_v51, %v1324_v50  ;;  %v1328_v57 = vld [vmem:[%s2323_s3 + $0x440] sm:$0xff]  ;;  %v1330_v58 = vld [vmem:[%s2323_s3 + $0x450] sm:$0xff]  ;;  %v1495_v59 = vpack.c.bf16 %v1331_v54, %v1329_v53  ;;  %v1333_v60 = vld [vmem:[%s2323_s3 + $0x468] sm:$0xff] }
  0x57   : > { %829 = vmatprep.mubr.f32.mxu0 %v1675_v23  ;;  %v1497_v62 = vpack.c.bf16 %v1330_v58, %v1328_v57  ;;  %v730_v63 = vld [vmem:[#allocation2 + $0x16] sm:$0xff]  ;;  %v1332_v0 = vld [vmem:[%s2323_s3 + $0x460] sm:$0xff]  ;;  %v1341_v14 = vld [vmem:[%s2323_s3 + $0x4a8] sm:$0xff] }
  0x58   : > { %1410 = vmatpush1.bf16.msra.mxu1 %v1409_v1  ;;  %v1334_v1 = vld [vmem:[%s2323_s3 + $0x470] sm:$0xff]  ;;  %v731_v6 = vld [vmem:[#allocation2 + $0x1e] sm:$0xff]  ;;  %v1345_v20 = vld [vmem:[%s2323_s3 + $0x4c8] sm:$0xff] }
  0x59   : > { %1474 = vmatpush1.bf16.msra.mxu0 %v1473_v2  ;;  %1412 = vmatprep.subr.bf16.mxu1 %v1411_v3  ;;  %v1499_v2 = vpack.c.bf16 %v1335_v61, %v1333_v60  ;;  %v1337_v3 = vld [vmem:[%s2323_s3 + $0x488] sm:$0xff]  ;;  %v1501_v5 = vpack.c.bf16 %v1334_v1, %v1332_v0  ;;  %v1336_v8 = vld [vmem:[%s2323_s3 + $0x480] sm:$0xff]  ;;  %v1338_v9 = vld [vmem:[%s2323_s3 + $0x490] sm:$0xff] }
  0x5a   : > { %1476 = vmatprep.subr.bf16.mxu0 %v1475_v7  ;;  %v1503_v7 = vpack.c.bf16 %v1339_v4, %v1337_v3  ;;  %v1343_v15 = vld [vmem:[%s2323_s3 + $0x4b8] sm:$0xff]  ;;  %v1505_v16 = vpack.c.bf16 %v1338_v9, %v1336_v8  ;;  %v1344_v25 = vld [vmem:[%s2323_s3 + $0x4c0] sm:$0xff]  ;;  %v1346_v26 = vld [vmem:[%s2323_s3 + $0x4d0] sm:$0xff] }
  0x5b   : > { %v1347_v21 = vld [vmem:[%s2323_s3 + $0x4d8] sm:$0xff]  ;;  %v1349_v27 = vld [vmem:[%s2323_s3 + $0x4e8] sm:$0xff]  ;;  %v1513_v29 = vpack.c.bf16 %v1346_v26, %v1344_v25 }
  0x5c   : > { %1414 = vmatpush1.bf16.msra.mxu1 %v1413_v17  ;;  %v1507_v17 = vpack.c.bf16 %v1343_v15, %v1341_v14  ;;  %v1351_v28 = vld [vmem:[%s2323_s3 + $0x4f8] sm:$0xff] }
  0x5d   : > { %1478 = vmatpush1.bf16.msra.mxu0 %v1477_v18  ;;  %1416 = vmatprep.subr.bf16.mxu1 %v1415_v19  ;;  %v1340_v18 = vld [vmem:[%s2323_s3 + $0x4a0] sm:$0xff]  ;;  %v1342_v19 = vld [vmem:[%s2323_s3 + $0x4b0] sm:$0xff] }
  0x5e   : > { %1480 = vmatprep.subr.bf16.mxu0 %v1479_v24  ;;  %v1509_v22 = vpack.c.bf16 %v1342_v19, %v1340_v18  ;;  %v1511_v24 = vpack.c.bf16 %v1347_v21, %v1345_v20 }
  0x60   : > { %1418 = vmatpush1.bf16.msra.mxu1 %v1417_v30  ;;  %v1515_v30 = vpack.c.bf16 %v1351_v28, %v1349_v27 }
  0x61   : > { %1482 = vmatpush1.bf16.msra.mxu0 %v1481_v31  ;;  %1420 = vmatprep.subr.bf16.mxu1 %v1419_v32  ;;  %v1348_v31 = vld [vmem:[%s2323_s3 + $0x4e0] sm:$0xff]  ;;  %v1350_v32 = vld [vmem:[%s2323_s3 + $0x4f0] sm:$0xff] }
  0x62   : > { %1484 = vmatprep.subr.bf16.mxu0 %v1483_v36  ;;  %v1517_v33 = vpack.c.bf16 %v1350_v32, %v1348_v31 }
  0x64   : > { %1422 = vmatpush1.bf16.msra.mxu1 %v1421_v40 }
  0x65   : > { %1486 = vmatpush1.bf16.msra.mxu0 %v1485_v41  ;;  %1519 = vmatprep.subr.bf16.mxu1 %v1487_v42 }
  0x66   : > { %1488 = vmatprep.subr.bf16.mxu0 %v1487_v42 }
  0x67   : > { %570 = vmatmul.mubr.f32.vlgmr.msra.gmra.mrb[0].mxu1 %v343_v47  ;;  %v998_v47 = vlaneseq }
  0x68   : > { %830 = vmatmul.mubr.f32.vlgmr.msra.gmra.mrb[0].mxu0 %v728_v49  ;;  %1527 = vmatpush1.bf16.msra.mxu1 %v1489_v48 }
  0x69   : > { %1490 = vmatpush1.bf16.msra.mxu0 %v1489_v48  ;;  %575 = vmatprep.mubr.f32.mxu1 %v1675_v23  ;;  %v996_v48 = vld [vmem:[%s2324_s4] sm:$0x3] }
  0x6a   : > { %835 = vmatprep.mubr.f32.mxu0 %v1675_v23  ;;  %1492 = vmatprep.subr.bf16.mxu0 %v1491_v52 }
  0x6b   : > { %576 = vmatmul.mubr.f32.gmra.mrb[2].mxu1 %v1764_v10  ;;  %1520 = vmatprep.subr.bf16.mxu1 %v1491_v52 }
  0x6c   : > { %836 = vmatmul.mubr.f32.gmra.mrb[2].mxu0 %v729_v56  ;;  %1528 = vmatpush1.bf16.msra.mxu1 %v1493_v55 }
  0x6d   : > { %1494 = vmatpush1.bf16.msra.mxu0 %v1493_v55  ;;  %581 = vmatprep.mubr.f32.mxu1 %v1675_v23 }
  0x6e   : > { %841 = vmatprep.mubr.f32.mxu0 %v1675_v23  ;;  %1496 = vmatprep.subr.bf16.mxu0 %v1495_v59 }
  0x6f   : > { %582 = vmatmul.mubr.f32.gmra.mrb[4].mxu1 %v1766_v11  ;;  %1521 = vmatprep.subr.bf16.mxu1 %v1495_v59 }
  0x70   : > { %842 = vmatmul.mubr.f32.gmra.mrb[4].mxu0 %v730_v63  ;;  %1529 = vmatpush1.bf16.msra.mxu1 %v1497_v62 }
  0x71   : > { %1498 = vmatpush1.bf16.msra.mxu0 %v1497_v62  ;;  %587 = vmatprep.mubr.f32.mxu1 %v1675_v23 }
  0x72   : > { %847 = vmatprep.mubr.f32.mxu0 %v1675_v23  ;;  %1500 = vmatprep.subr.bf16.mxu0 %v1499_v2 }
  0x73   : > { %588 = vmatmul.mubr.f32.gmra.mrb[6].mxu1 %v1768_v12  ;;  %1522 = vmatprep.subr.bf16.mxu1 %v1499_v2 }
  0x74   : > { %848 = vmatmul.mubr.f32.gmra.mrb[6].mxu0 %v731_v6  ;;  %1530 = vmatpush1.bf16.msra.mxu1 %v1501_v5 }
  0x75   : > { %1502 = vmatpush1.bf16.msra.mxu0 %v1501_v5  ;;  %1523 = vmatprep.subr.bf16.mxu1 %v1503_v7 }
  0x76   : > { %1504 = vmatprep.subr.bf16.mxu0 %v1503_v7  ;;  %963 = vmatprep.mubr.f32.mxu0 %v1675_v23 }
  0x77   : > { %975 = vmatprep.mubr.f32.mxu1 %v1675_v23 }
  0x78   : > { %1531 = vmatpush1.bf16.msra.mxu1 %v1505_v16 }
  0x79   : > { %1506 = vmatpush1.bf16.msra.mxu0 %v1505_v16  ;;  %1524 = vmatprep.subr.bf16.mxu1 %v1507_v17 }
  0x7a   : > { %1508 = vmatprep.subr.bf16.mxu0 %v1507_v17 }
  0x7c   : > { %1532 = vmatpush1.bf16.msra.mxu1 %v1509_v22 }
  0x7d   : > { %1510 = vmatpush1.bf16.msra.mxu0 %v1509_v22  ;;  %1525 = vmatprep.subr.bf16.mxu1 %v1511_v24 }
  0x7e   : > { %1512 = vmatprep.subr.bf16.mxu0 %v1511_v24 }
  0x80   : > { %1533 = vmatpush1.bf16.msra.mxu1 %v1513_v29 }
  0x81   : > { %1514 = vmatpush1.bf16.msra.mxu0 %v1513_v29  ;;  %1526 = vmatprep.subr.bf16.mxu1 %v1515_v30 }
  0x82   : > { %1516 = vmatprep.subr.bf16.mxu0 %v1515_v30 }
  0x84   : > { %1534 = vmatpush1.bf16.msra.mxu1 %v1517_v33 }
  0x85   : > { %1518 = vmatpush1.bf16.msra.mxu0 %v1517_v33 }
  0x87   : > { %976 = vmatmul.mubr.f32.vlgmr.msra.gmra.mrb[8].mxu1 %v1768_v12 }
  0x88   : > { %964 = vmatmul.mubr.f32.vlgmr.msra.gmra.mrb[0].mxu0 %v1764_v10  ;;  %981 = vmatprep.mubr.f32.mxu1 %v1675_v23 }
  0x89   : > { %969 = vmatprep.mubr.f32.mxu0 %v1675_v23 }
  0x8b   : > { %982 = vmatmul.mubr.f32.gmra.mrb[10].mxu1 %v1770_v13  ;;  %v2287_v13 = vshrl.u32 %v998_v47, 7 }
  0x8c   : > { %970 = vmatmul.mubr.f32.gmra.mrb[2].mxu0 %v1766_v11 }
  0x8d   : > { %v1000_v11 = vsub.s32 0, %v2287_v13  ;;  %v1004_v2 = vsub.s32 1, %v2287_v13 }
  0x8f   : > { %v1001_v49 = vrot.slane %v996_v48, %v1000_v11  ;;  %v1005_v14 = vrot.slane %v996_v48, %v1004_v2 }
 0x13a   : > { %v571_v34 = vpop.f32.mrb[0].mxu1 }
 0x13b   : > { %v573_v35 = vpop.f32.mrb[1].mxu1 }
 0x13e   : > { %v577_v36 = vpop.f32.mrb[2].mxu1 }
 0x13f   : > { %v579_v37 = vpop.f32.mrb[3].mxu1 }
 0x142   : > { %v583_v38 = vpop.f32.mrb[4].mxu1 }
 0x143   : > { %v843_v39 = vpop.f32.mrb[4].mxu0  ;;  %v585_v40 = vpop.f32.mrb[5].mxu1 }
 0x144   : > { %v1539_v41 = vadd.f32 %v843_v39, %v583_v38  ;;  %v845_v42 = vpop.f32.mrb[5].mxu0 }
 0x145   : > { %v1541_v12 = vadd.f32 %v845_v42, %v585_v40 }
 0x146   : > { %v589_v43 = vpop.f32.mrb[6].mxu1 }
 0x147   : > { %v849_v10 = vpop.f32.mrb[6].mxu0  ;;  %v591_v44 = vpop.f32.mrb[7].mxu1 }
 0x148   : > { %v1543_v45 = vadd.f32 %v849_v10, %v589_v43  ;;  %v851_v46 = vpop.f32.mrb[7].mxu0 }
 0x149   : > { %v1545_v23 = vadd.f32 %v851_v46, %v591_v44 }
 0x15a   : > { %v977_v50 = vpop.f32.mrb[8].mxu1 }
 0x15b   : > { %v965_v51 = vpop.f32.mrb[0].mxu0  ;;  %v1540_v52 = vadd.f32 %v1539_v41, %v977_v50  ;;  %v979_v53 = vpop.f32.mrb[9].mxu1  ;;  %v1676_v41 = vmov (!%p1222_p7), 0.0  }
 0x15c   : > { %v1535_v54 = vadd.f32 %v965_v51, %v571_v34  ;;  %v967_v55 = vpop.f32.mrb[1].mxu0  ;;  %v1542_v56 = vadd.f32 %v1541_v12, %v979_v53  ;;  %1055 = vst [vmem:[%s1748_s10] sm:$0xff] (!%p1222_p7), %v1676_v41 }
 0x15d   : > { %v1012_v57 = vadd.f32 %v1540_v52, %v1001_v49  ;;  %v1536_v58 = vadd.f32 %v967_v55, %v573_v35 }
 0x15e   : > { %v1008_v59 = vadd.f32 %v1535_v54, %v1001_v49  ;;  %v983_v60 = vpop.f32.mrb[10].mxu1  ;;  %v1013_v16 = vadd.f32 %v1542_v56, %v1005_v14 }
 0x15f   : > { %v1354_v61 = vmul.f32 -1.442695, %v1012_v57  ;;  %v971_v62 = vpop.f32.mrb[2].mxu0  ;;  %v1544_v63 = vadd.f32 %v1543_v45, %v983_v60  ;;  %v985_v0 = vpop.f32.mrb[11].mxu1  ;;  %v1009_v17 = vadd.f32 %v1536_v58, %v1005_v14 }
 0x160   : > { %v1352_v1 = vmul.f32 -1.442695, %v1008_v59  ;;  %v1537_v3 = vadd.f32 %v971_v62, %v577_v36  ;;  %v973_v4 = vpop.f32.mrb[3].mxu0  ;;  %v1546_v5 = vadd.f32 %v1545_v23, %v985_v0 }
 0x161   : > { %1610 = vpow2.f32 %v1354_v61  ;;  %v1014_v6 = vadd.f32 %v1544_v63, %v1001_v49  ;;  %v1538_v7 = vadd.f32 %v973_v4, %v579_v37 }
 0x162   : > { %1612 = vpow2.f32 %v1352_v1  ;;  %v1010_v8 = vadd.f32 %v1537_v3, %v1001_v49  ;;  %v1015_v21 = vadd.f32 %v1546_v5, %v1005_v14 }
 0x163   : > { %v1355_v9 = vmul.f32 -1.442695, %v1014_v6  ;;  %v1011_v24 = vadd.f32 %v1538_v7, %v1005_v14 }
 0x164   : > { %v1353_v15 = vmul.f32 -1.442695, %v1010_v8 }
 0x165   : > { %1614 = vpow2.f32 %v1355_v9 }
 0x166   : > { %1616 = vpow2.f32 %v1353_v15 }
 0x167   : > { %1618 = vtanh.f32 %v1013_v16 }
 0x168   : > { %1620 = vtanh.f32 %v1009_v17 }
 0x16b   : > { %v1611_v18 = vpop.eup %1610 }
 0x16c   : > { %v1613_v19 = vpop.eup %1612  ;;  %v1030_v20 = vadd.f32 1.0, %v1611_v18 }
 0x16d   : > { %v1028_v22 = vadd.f32 1.0, %v1613_v19 }
 0x16e   : > { %1622 = vrcp.f32 %v1030_v20 }
 0x16f   : > { %v1615_v25 = vpop.eup %1614  ;;  %1624 = vrcp.f32 %v1028_v22 }
 0x170   : > { %v1617_v26 = vpop.eup %1616  ;;  %v1031_v27 = vadd.f32 1.0, %v1615_v25  ;;  %1626 = vtanh.f32 %v1015_v21 }
 0x171   : > { %v1029_v28 = vadd.f32 1.0, %v1617_v26  ;;  %1628 = vtanh.f32 %v1011_v24  ;;  %v1619_v29 = vpop.eup %1618 }
 0x172   : > { %1630 = vrcp.f32 %v1031_v27  ;;  %v1621_v30 = vpop.eup %1620 }
 0x173   : > { %1632 = vrcp.f32 %v1029_v28 }
 0x178   : > { %v1623_v31 = vpop.eup %1622 }
 0x179   : > { %v1625_v32 = vpop.eup %1624  ;;  %v1046_v33 = vmul.f32 %v1623_v31, %v1619_v29 }
 0x17a   : > { %v1627_v34 = vpop.eup %1626  ;;  %v1044_v35 = vmul.f32 %v1625_v32, %v1621_v30  ;;  %1054 = sbr.rel (%p1222_p7) target bundleno = 385 (0x181), region = 52 }
 0x17b   : > { %v1629_v36 = vpop.eup %1628  ;;  %1050 = vst [vmem:[%s1759_s19 + $0x10] sm:$0xff] %v1046_v33 }
 0x17c   : > { %v1631_v37 = vpop.eup %1630  ;;  %1048 = vst [vmem:[%s1759_s19] sm:$0xff] %v1044_v35 }
 0x17d   : > { %v1633_v38 = vpop.eup %1632  ;;  %v1047_v39 = vmul.f32 %v1631_v37, %v1627_v34 }
 0x17e   : > { %v1045_v40 = vmul.f32 %v1633_v38, %v1629_v36 }
 0x17f   : > { %1051 = vst [vmem:[%s1759_s19 + $0x18] sm:$0xff] %v1047_v39 }
 0x180   : > { %1049 = vst [vmem:[%s1759_s19 + $0x8] sm:$0xff] %v1045_v40 }
 0x181 PF: > { %v1056_v42 = vadd.f32 %v1045_v40, %v1044_v35  ;;  %v1065_v12 = vmul.f32 %v1044_v35, %v1044_v35  ;;  %v1066_v43 = vmul.f32 %v1045_v40, %v1045_v40  ;;  %v1067_v10 = vmul.f32 %v1046_v33, %v1046_v33  ;;  %v1084_v60 = vld [vmem:[%s1748_s10] sm:$0xff] }
 0x182   : > { %v1068_v45 = vmul.f32 %v1047_v39, %v1047_v39  ;;  %vm1081_vm0 = vcmp.eq.s32.totalorder %v2287_v13, 1  ;;  %vm1080_vm1 = vcmp.eq.s32.totalorder %v2287_v13, 0 }
 0x183   : > { %v1057_v44 = vadd.f32 %v1056_v42, %v1046_v33  ;;  %v1069_v46 = vadd.f32 %v1066_v43, %v1065_v12 }
 0x185   : > { %v1058_v23 = vadd.f32 %v1057_v44, %v1047_v39  ;;  %v1070_v47 = vadd.f32 %v1069_v46, %v1067_v10 }
 0x187   : > { %v1059_v11 = vrot.slane %v1058_v23, 4  ;;  %v1071_v48 = vadd.f32 %v1070_v47, %v1068_v45 }
 0x189   : > { %v1060_v49 = vadd.f32 %v1059_v11, %v1058_v23  ;;  %v1072_v50 = vrot.slane %v1071_v48, 4 }
 0x18b   : > { %v1061_v51 = vrot.slane %v1060_v49, 2  ;;  %v1073_v52 = vadd.f32 %v1072_v50, %v1071_v48 }
 0x18d   : > { %v1062_v53 = vadd.f32 %v1061_v51, %v1060_v49  ;;  %v1074_v54 = vrot.slane %v1073_v52, 2 }
 0x18f   : > { %v1063_v55 = vrot.slane %v1062_v53, 1  ;;  %v1075_v56 = vadd.f32 %v1074_v54, %v1073_v52 }
 0x191   : > { %v1076_v57 = vrot.slane %v1075_v56, 1  ;;  %v1064_v58 = vadd.f32 %v1063_v55, %v1062_v53 }
 0x193   : > { %v1077_v59 = vadd.f32 %v1076_v57, %v1075_v56 }
 0x195   : > { %v1082_v61 = vsel %vm1081_vm0, %v1077_v59, 0.0 }
 0x196   : > { %v1083_v62 = vsel %vm1080_vm1, %v1064_v58, %v1082_v61 }
 0x197   : > { %v1085_v63 = vadd.f32 %v1084_v60, %v1083_v62 }
 0x199   : > { %1086 = vst [vmem:[%s1748_s10] sm:$0xff] %v1085_v63 }
 0x19a PF: > { %s17_s25 = sadd.s32 1, %s1672_s25   ;;  %s2327_s21 = smov %s1664_s23 }
 0x19b   : > { %p14_p9 = scmp.ge.s32.totalorder %s17_s25, 18   ;;  %s2328_s22 = smov %s1668_s24 }
 0x19c   : > { %s2329_s23 = smov %s2332_s26  ;;  %s2330_s24 = smov %s2336_s27 }
 0x19d   :  { %16 = sbr.rel (!%p14_p9) target bundleno = 3 (0x3), region = 98 }

</bundles_post_ra>
